<compile_context>
chip_gen: v5e
topology: v5e:2x2
jax: 0.10.0
libtpu: 0.0.40
codegen_flags: <defaults>
</compile_context>

<pallas_src>
import math
from functools import partial

import jax
import jax.numpy as jnp
from jax import lax
from jax.experimental import pallas as pl
from jax.experimental.pallas import tpu as pltpu


_INV_SQRT2 = 1.0 / math.sqrt(2.0)


def _gelu_exact(x):
    # nn.GELU() default = exact (erf) GELU
    return 0.5 * x * (1.0 + lax.erf(x * _INV_SQRT2))


# ----------------------------------------------------------------------------
# Pallas kernel: fused  temb = sin(x*d + phase)/sqrt(E);  cond = h_emb(cond);
#                       base = temb + (demb + bh) + cond;  y = base;
#                       L x [ y = gelu(linear(y)) + base ];
#                       out_row = to_time(y)   (lane-dense (1, blk_t))
# ----------------------------------------------------------------------------
def _denoise_kernel(x_ref, div_ref, phase_ref, bias_ref, cond_ref,
                    wh_ref, wl_ref, bl_ref, wt_ref, bt_ref, out_ref,
                    *, layer_num, inv_sqrt_e, compute_dtype, gelu_approx):
    # ---- trigonometric time embedding: single phase-shifted sin on the EUP --
    # pe[:, 2k] = sin(x*d_k), pe[:, 2k+1] = cos(x*d_k) = sin(x*d_k + pi/2)
    xt = x_ref[...]                                             # (blk_t, 1) f32
    temb = jnp.sin(xt * div_ref[...] + phase_ref[...]) * inv_sqrt_e   # (blk_t, E)

    # ---- cond = self.h_emb(cond)  (bias folded into bias_ref) ---------------
    cproj = jnp.dot(cond_ref[...], wh_ref[...],
                    preferred_element_type=jnp.float32)

    # base = time_emb + (diff_emb + bh) + cond ; bias_ref is (1, E), broadcasts
    base = temb + bias_ref[...] + cproj
    y = base

    act = (lambda v: jax.nn.gelu(v, approximate=True)) if gelu_approx else _gelu_exact
    for l in range(layer_num):                                  # static unrolled
        h = jnp.dot(y.astype(compute_dtype), wl_ref[l],
                    preferred_element_type=jnp.float32) + bl_ref[l]
        y = act(h) + base

    # ---- to_time: (1,E) contracted with (blk_t,E) on E -> lane-dense (1,blk_t)
    out = lax.dot_general(wt_ref[...], y.astype(compute_dtype),
                          dimension_numbers=(((1,), (1,)), ((), ())),
                          preferred_element_type=jnp.float32) + bt_ref[0]
    out_ref[...] = out.astype(out_ref.dtype)


def _pick_blk_t(T, B, target=2048):
    """Token tile: full T when small; else largest 128-multiple divisor <= target.

    For B == 1 the T axis is kept in >= 2 tiles so both v7x TCs get work.
    (At blk_t >= ~4096 the (blk_t,1) times block pads to 128 lanes in VMEM
    (~blk_t*512 B per buffer) -- kept below that by the 2048 target.)"""
    if B == 1:
        target = min(target, max(T // 2, 128))
    if T <= target:
        return T
    best = None
    for cand in range(128, min(target, T) + 1, 128):
        if T % cand == 0:
            best = cand
    return best if best is not None else T


def denoise_pallas(x, demb, cond, params, *, blk_t=None,
                   matmul_dtype=jnp.float32, gelu_approx=False):
    """x: (B,T,1) f32 times, demb: (B,E) diffusion embedding, cond: (B,T,E).

    Returns (B, T, 1) f32.  matmul_dtype=jnp.bfloat16 enables the bf16-in /
    f32-accumulate MXU speed mode (small numeric drift vs the f32 reference)."""
    B, T, _ = x.shape
    E = cond.shape[-1]
    L = params["wl"].shape[0]
    assert E % 2 == 0
    if blk_t is None:
        blk_t = _pick_blk_t(T, B)
    assert T % blk_t == 0

    cdt = jnp.dtype(matmul_dtype)

    # d_{j//2} and the [0, pi/2, 0, pi/2, ...] phase, each as a (1, E) constant.
    half = E // 2
    div_term = jnp.exp(jnp.arange(half, dtype=jnp.float32) *
                       (-math.log(10000.0) * 2.0 / E))
    div_full = jnp.repeat(div_term, 2)[None, :]                       # (1, E)
    phase = jnp.tile(jnp.array([0.0, math.pi / 2.0], jnp.float32), half)[None, :]

    # Fold diffusion embedding + h_emb bias into a single per-batch f32 bias.
    bias = demb.reshape(B, 1, E) + params["bh"]                       # (B, 1, E)

    wh, wl, wt = params["wh"], params["wl"], params["wt"]
    cond_in = cond
    if cdt != jnp.float32:
        wh, wl, wt = wh.astype(cdt), wl.astype(cdt), wt.astype(cdt)
        cond_in = cond.astype(cdt)
    bl = params["bl"]                                                 # f32, post-MXU
    bt = params["bt"].reshape((1,)).astype(jnp.float32)               # scalar (SMEM)

    # Generation-aware VMEM budget: v5e/v6e 128 MiB phys -> 96 MiB, v7x -> 48 MiB.
    try:
        vmem_cap = int(pltpu.get_tpu_info().vmem_capacity_bytes)
    except Exception:
        vmem_cap = 64 * 1024 * 1024
    vmem_limit = int(min(vmem_cap * 3 // 4, 100 * 1024 * 1024))

    N = B * T
    wbytes = cdt.itemsize
    cost = pl.CostEstimate(
        flops=int(2 * N * E * E * (L + 1) + 2 * N * E),
        transcendentals=int(N * E * (1 + L)),                         # sin + gelu
        bytes_accessed=int(N * E * wbytes + 4 * N + 4 * B * E
                           + (L + 1) * E * E * wbytes + 4 * L * E + E * wbytes
                           + 8 * E + 4 * N),
    )

    grid = (B, T // blk_t)

    def call(single_buffer_weights):
        def wspec(shape, imap):
            # Resident (constant-index) blocks: one VMEM buffer is enough; the
            # default double buffer is pure waste for a large (L,E,E) stack.
            if single_buffer_weights:
                return pl.BlockSpec(shape, imap, pipeline_mode=pl.Buffered(1))
            return pl.BlockSpec(shape, imap)

        return pl.pallas_call(
            partial(_denoise_kernel, layer_num=L, inv_sqrt_e=1.0 / math.sqrt(E),
                    compute_dtype=cdt, gelu_approx=gelu_approx),
            out_shape=jax.ShapeDtypeStruct((B, 1, T), jnp.float32),
            grid=grid,
            in_specs=[
                pl.BlockSpec((None, blk_t, 1), lambda b, t: (b, t, 0)),   # x times
                wspec((1, E), lambda b, t: (0, 0)),                       # div
                wspec((1, E), lambda b, t: (0, 0)),                       # phase
                pl.BlockSpec((None, 1, E), lambda b, t: (b, 0, 0)),       # demb+bh
                pl.BlockSpec((None, blk_t, E), lambda b, t: (b, t, 0)),   # cond
                wspec((E, E), lambda b, t: (0, 0)),                       # Wh (in,out)
                wspec((L, E, E), lambda b, t: (0, 0, 0)),                 # Wl stack
                wspec((L, 1, E), lambda b, t: (0, 0, 0)),                 # bl stack
                wspec((1, E), lambda b, t: (0, 0)),                       # wt row
                pl.BlockSpec(memory_space=pltpu.MemorySpace.SMEM),        # bt scalar
            ],
            out_specs=pl.BlockSpec((None, 1, blk_t), lambda b, t: (b, 0, t)),
            compiler_params=pltpu.CompilerParams(
                dimension_semantics=("parallel", "parallel"),
                vmem_limit_bytes=vmem_limit),
            cost_estimate=cost,
        )(x, div_full, phase, bias, cond_in, wh, wl, bl, wt, bt)

    try:
        out = call(True)
    except Exception:
        # pipeline_mode=pl.Buffered(1) not supported on this jax version;
        # fall back to default (double-buffered) resident blocks.
        out = call(False)

    # (B, 1, T) -> (B, T, 1): middle axis is size-1, row-major reshape is exact.
    return out.reshape(B, T, 1)


# ----------------------------------------------------------------------------
# JAX glue: embeddings (standard sinusoidal / CSDI definitions)
# ----------------------------------------------------------------------------
def trigono_time_embedding(x, embed_size):
    """x: (B, T) continuous time values -> (B, T, E) interleaved sin/cos."""
    half = embed_size // 2
    div_term = jnp.exp(jnp.arange(half, dtype=jnp.float32) *
                       (-math.log(10000.0) * 2.0 / embed_size))       # (half,)
    ang = x[..., None] * div_term                                      # (B, T, half)
    pe = jnp.zeros((*x.shape, embed_size), dtype=jnp.float32)
    pe = pe.at[..., 0::2].set(jnp.sin(ang))
    pe = pe.at[..., 1::2].set(jnp.cos(ang))
    return pe


def build_diffusion_table(max_steps, embed_size):
    dim = embed_size // 2
    steps = jnp.arange(max_steps, dtype=jnp.float32)[:, None]          # (S,1)
    freqs = 10.0 ** (jnp.arange(dim, dtype=jnp.float32) * 4.0 / (dim - 1))[None, :]
    table = steps * freqs
    return jnp.concatenate([jnp.sin(table), jnp.cos(table)], axis=1)   # (S, E)


def diffusion_time_embedding(t, table, p1_w, p1_b, p2_w, p2_b):
    """t: (B,) int steps -> (B, E) ; CSDI-style embedding + 2-layer SiLU MLP."""
    x = table[t]                                   # (B, E)
    x = jax.nn.silu(x @ p1_w + p1_b)
    x = jax.nn.silu(x @ p2_w + p2_b)
    return x


# ----------------------------------------------------------------------------
# Parameter init (deterministic, PyTorch-Linear-like uniform init)
# ----------------------------------------------------------------------------
def init_params(key, embed_size, layer_num):
    E = embed_size
    ks = jax.random.split(key, 8)
    u = lambda k, shape, fan_in: jax.random.uniform(
        k, shape, jnp.float32, -1.0 / math.sqrt(fan_in), 1.0 / math.sqrt(fan_in))
    params = {
        # stored already transposed: (in, out) so the kernel does x @ W + b
        "wh": u(ks[0], (E, E), E),
        "bh": u(ks[1], (1, E), E),
        "wl": u(ks[2], (layer_num, E, E), E),
        "bl": u(ks[3], (layer_num, 1, E), E),
        "wt": u(ks[4], (1, E), E),      # to_time weight, kept as a row
        "bt": u(ks[5], (1, 1), E),
    }
    kd = jax.random.split(ks[6], 4)
    diff = {
        "p1_w": u(kd[0], (E, E), E), "p1_b": u(kd[1], (E,), E),
        "p2_w": u(kd[2], (E, E), E), "p2_b": u(kd[3], (E,), E),
    }
    return params, diff


# ----------------------------------------------------------------------------
# Full forward (glue + kernel) and a pure-JAX reference
# ----------------------------------------------------------------------------
def denoise_net_forward(x, t, cond, params, diff_params, diff_table, **kwargs):
    demb = diffusion_time_embedding(t, diff_table, diff_params["p1_w"],
                                    diff_params["p1_b"], diff_params["p2_w"],
                                    diff_params["p2_b"])            # (B, E)
    return denoise_pallas(x, demb, cond, params, **kwargs)


def denoise_net_reference(x, t, cond, params, diff_params, diff_table, embed_size):
    B, T, _ = x.shape
    temb = trigono_time_embedding(jnp.squeeze(x, -1), embed_size) / math.sqrt(embed_size)
    demb = diffusion_time_embedding(t, diff_table, diff_params["p1_w"],
                                    diff_params["p1_b"], diff_params["p2_w"],
                                    diff_params["p2_b"])[:, None, :]
    c = cond @ params["wh"] + params["bh"][0]
    base = temb + demb + c
    y = base
    for l in range(params["wl"].shape[0]):
        y = _gelu_exact(y @ params["wl"][l] + params["bl"][l, 0]) + base
    return y @ params["wt"][0][:, None] + params["bt"][0]


if __name__ == "__main__":
    embed_size, layer_num, diff_steps = 32, 2, 50
    B, T = 2, 8

    key = jax.random.PRNGKey(0)
    k_x, k_t, k_c, k_p = jax.random.split(key, 4)

    x = jax.random.normal(k_x, (B, T, 1), jnp.float32) * 5.0        # continuous times
    t = jax.random.randint(k_t, (B,), 0, diff_steps + 1)            # diffusion steps
    cond = jax.random.normal(k_c, (B, T, embed_size), jnp.float32)

    params, diff_params = init_params(k_p, embed_size, layer_num)
    diff_table = build_diffusion_table(diff_steps + 1, embed_size)

    # f32 path: matches the PyTorch (f32, exact-erf GELU) numerics.
    out = denoise_net_forward(x, t, cond, params, diff_params, diff_table)
    out = jax.block_until_ready(out)

    ref = denoise_net_reference(x, t, cond, params, diff_params, diff_table, embed_size)
    assert out.shape == (B, T, 1)
    assert jnp.allclose(out, ref, atol=1e-3, rtol=1e-3), "mismatch vs JAX reference"

    # bf16-matmul speed mode (v6e/v7x MXU path); loose check vs the f32 reference.
    out_bf16 = denoise_net_forward(x, t, cond, params, diff_params, diff_table,
                                   matmul_dtype=jnp.bfloat16)
    out_bf16 = jax.block_until_ready(out_bf16)
    rel = jnp.linalg.norm(out_bf16 - ref) / (jnp.linalg.norm(ref) + 1e-6)
    assert float(rel) < 5e-2, "bf16 speed mode drifted too far from f32 reference"

    print("KERNEL_OK")
</pallas_src>

<mosaic_0001>
module attributes {stable_mosaic.version = 11 : i64} {
  func.func @_denoise_kernel(%arg0: i32, %arg1: i32, %arg2: memref<1x8x1xf32, #tpu.memory_space<vmem>>, %arg3: memref<1x32xf32, #tpu.memory_space<vmem>>, %arg4: memref<1x32xf32, #tpu.memory_space<vmem>>, %arg5: memref<1x1x32xf32, #tpu.memory_space<vmem>>, %arg6: memref<1x8x32xf32, #tpu.memory_space<vmem>>, %arg7: memref<32x32xf32, #tpu.memory_space<vmem>>, %arg8: memref<2x32x32xf32, #tpu.memory_space<vmem>>, %arg9: memref<2x1x32xf32, #tpu.memory_space<vmem>>, %arg10: memref<1x32xf32, #tpu.memory_space<vmem>>, %arg11: memref<1xf32, #tpu.memory_space<smem>>, %arg12: memref<1x1x8xf32, #tpu.memory_space<vmem>>) attributes {dimension_semantics = [#tpu.dimension_semantics<parallel>, #tpu.dimension_semantics<parallel>], iteration_bounds = array<i64: 2, 1>, scalar_prefetch = 0 : i64, scratch_operands = 0 : i64, tpu.core_type = #tpu.core_type<tc>, window_params = [{transform_indices = @transform_0, window_bounds = array<i64: 1, 8, 1>}, {pipeline_mode = #tpu.pipeline_mode<synchronous>, transform_indices = @transform_1, window_bounds = array<i64: 1, 32>}, {pipeline_mode = #tpu.pipeline_mode<synchronous>, transform_indices = @transform_2, window_bounds = array<i64: 1, 32>}, {transform_indices = @transform_3, window_bounds = array<i64: 1, 1, 32>}, {transform_indices = @transform_4, window_bounds = array<i64: 1, 8, 32>}, {pipeline_mode = #tpu.pipeline_mode<synchronous>, transform_indices = @transform_5, window_bounds = array<i64: 32, 32>}, {pipeline_mode = #tpu.pipeline_mode<synchronous>, transform_indices = @transform_6, window_bounds = array<i64: 2, 32, 32>}, {pipeline_mode = #tpu.pipeline_mode<synchronous>, transform_indices = @transform_7, window_bounds = array<i64: 2, 1, 32>}, {pipeline_mode = #tpu.pipeline_mode<synchronous>, transform_indices = @transform_8, window_bounds = array<i64: 1, 32>}, {transform_indices = @transform_9, window_bounds = array<i64: 1>}, {transform_indices = @transform_10, window_bounds = array<i64: 1, 1, 8>}]} {
    %c0 = arith.constant 0 : index
    %c0_0 = arith.constant 0 : index
    %c0_1 = arith.constant 0 : index
    %0 = vector.load %arg2[%c0, %c0_0, %c0_1] : memref<1x8x1xf32, #tpu.memory_space<vmem>>, vector<1x8x1xf32>
    %1 = vector.shape_cast %0 : vector<1x8x1xf32> to vector<8x1xf32>
    %c0_2 = arith.constant 0 : index
    %c0_3 = arith.constant 0 : index
    %2 = vector.load %arg3[%c0_2, %c0_3] : memref<1x32xf32, #tpu.memory_space<vmem>>, vector<1x32xf32>
    %3 = vector.broadcast %1 : vector<8x1xf32> to vector<8x32xf32>
    %4 = vector.broadcast %2 : vector<1x32xf32> to vector<8x32xf32>
    %5 = arith.mulf %3, %4 : vector<8x32xf32>
    %c0_4 = arith.constant 0 : index
    %c0_5 = arith.constant 0 : index
    %6 = vector.load %arg4[%c0_4, %c0_5] : memref<1x32xf32, #tpu.memory_space<vmem>>, vector<1x32xf32>
    %7 = vector.broadcast %6 : vector<1x32xf32> to vector<8x32xf32>
    %8 = arith.addf %5, %7 : vector<8x32xf32>
    %9 = math.sin %8 : vector<8x32xf32>
    %cst = arith.constant 0.176776692 : f32
    %10 = vector.broadcast %cst : f32 to vector<8x32xf32>
    %11 = arith.mulf %9, %10 : vector<8x32xf32>
    %c0_6 = arith.constant 0 : index
    %c0_7 = arith.constant 0 : index
    %c0_8 = arith.constant 0 : index
    %12 = vector.load %arg6[%c0_6, %c0_7, %c0_8] : memref<1x8x32xf32, #tpu.memory_space<vmem>>, vector<1x8x32xf32>
    %13 = vector.shape_cast %12 : vector<1x8x32xf32> to vector<8x32xf32>
    %c0_9 = arith.constant 0 : index
    %c0_10 = arith.constant 0 : index
    %14 = vector.load %arg7[%c0_9, %c0_10] : memref<32x32xf32, #tpu.memory_space<vmem>>, vector<32x32xf32>
    %cst_11 = arith.constant dense<0.000000e+00> : vector<8x32xf32>
    %15 = tpu.matmul %13, %14, %cst_11 {dimension_numbers = #tpu.dot_dimension_numbers<[1], [0], [0], [1], [0, 0, 1, 1], [], []>} : vector<8x32xf32>, vector<32x32xf32>, vector<8x32xf32> -> vector<8x32xf32>
    %c0_12 = arith.constant 0 : index
    %c0_13 = arith.constant 0 : index
    %c0_14 = arith.constant 0 : index
    %16 = vector.load %arg5[%c0_12, %c0_13, %c0_14] : memref<1x1x32xf32, #tpu.memory_space<vmem>>, vector<1x1x32xf32>
    %17 = vector.shape_cast %16 : vector<1x1x32xf32> to vector<1x32xf32>
    %18 = vector.broadcast %17 : vector<1x32xf32> to vector<8x32xf32>
    %19 = arith.addf %11, %18 : vector<8x32xf32>
    %20 = arith.addf %19, %15 : vector<8x32xf32>
    %c0_15 = arith.constant 0 : index
    %c0_16 = arith.constant 0 : index
    %c0_17 = arith.constant 0 : index
    %21 = vector.load %arg8[%c0_15, %c0_16, %c0_17] : memref<2x32x32xf32, #tpu.memory_space<vmem>>, vector<1x32x32xf32>
    %22 = vector.shape_cast %21 : vector<1x32x32xf32> to vector<32x32xf32>
    %cst_18 = arith.constant dense<0.000000e+00> : vector<8x32xf32>
    %23 = tpu.matmul %20, %22, %cst_18 {dimension_numbers = #tpu.dot_dimension_numbers<[1], [0], [0], [1], [0, 0, 1, 1], [], []>} : vector<8x32xf32>, vector<32x32xf32>, vector<8x32xf32> -> vector<8x32xf32>
    %c0_19 = arith.constant 0 : index
    %c0_20 = arith.constant 0 : index
    %c0_21 = arith.constant 0 : index
    %24 = vector.load %arg9[%c0_19, %c0_20, %c0_21] : memref<2x1x32xf32, #tpu.memory_space<vmem>>, vector<1x1x32xf32>
    %25 = vector.shape_cast %24 : vector<1x1x32xf32> to vector<1x32xf32>
    %26 = vector.broadcast %25 : vector<1x32xf32> to vector<8x32xf32>
    %27 = arith.addf %23, %26 : vector<8x32xf32>
    %cst_22 = arith.constant 5.000000e-01 : f32
    %28 = vector.broadcast %cst_22 : f32 to vector<8x32xf32>
    %29 = arith.mulf %28, %27 : vector<8x32xf32>
    %cst_23 = arith.constant 0.707106769 : f32
    %30 = vector.broadcast %cst_23 : f32 to vector<8x32xf32>
    %31 = arith.mulf %27, %30 : vector<8x32xf32>
    %32 = math.erf %31 : vector<8x32xf32>
    %cst_24 = arith.constant 1.000000e+00 : f32
    %33 = vector.broadcast %cst_24 : f32 to vector<8x32xf32>
    %34 = arith.addf %33, %32 : vector<8x32xf32>
    %35 = arith.mulf %29, %34 : vector<8x32xf32>
    %36 = arith.addf %35, %20 : vector<8x32xf32>
    %c1 = arith.constant 1 : index
    %c0_25 = arith.constant 0 : index
    %c0_26 = arith.constant 0 : index
    %37 = vector.load %arg8[%c1, %c0_25, %c0_26] : memref<2x32x32xf32, #tpu.memory_space<vmem>>, vector<1x32x32xf32>
    %38 = vector.shape_cast %37 : vector<1x32x32xf32> to vector<32x32xf32>
    %cst_27 = arith.constant dense<0.000000e+00> : vector<8x32xf32>
    %39 = tpu.matmul %36, %38, %cst_27 {dimension_numbers = #tpu.dot_dimension_numbers<[1], [0], [0], [1], [0, 0, 1, 1], [], []>} : vector<8x32xf32>, vector<32x32xf32>, vector<8x32xf32> -> vector<8x32xf32>
    %c1_28 = arith.constant 1 : index
    %c0_29 = arith.constant 0 : index
    %c0_30 = arith.constant 0 : index
    %40 = vector.load %arg9[%c1_28, %c0_29, %c0_30] : memref<2x1x32xf32, #tpu.memory_space<vmem>>, vector<1x1x32xf32>
    %41 = vector.shape_cast %40 : vector<1x1x32xf32> to vector<1x32xf32>
    %42 = vector.broadcast %41 : vector<1x32xf32> to vector<8x32xf32>
    %43 = arith.addf %39, %42 : vector<8x32xf32>
    %cst_31 = arith.constant 5.000000e-01 : f32
    %44 = vector.broadcast %cst_31 : f32 to vector<8x32xf32>
    %45 = arith.mulf %44, %43 : vector<8x32xf32>
    %cst_32 = arith.constant 0.707106769 : f32
    %46 = vector.broadcast %cst_32 : f32 to vector<8x32xf32>
    %47 = arith.mulf %43, %46 : vector<8x32xf32>
    %48 = math.erf %47 : vector<8x32xf32>
    %cst_33 = arith.constant 1.000000e+00 : f32
    %49 = vector.broadcast %cst_33 : f32 to vector<8x32xf32>
    %50 = arith.addf %49, %48 : vector<8x32xf32>
    %51 = arith.mulf %45, %50 : vector<8x32xf32>
    %52 = arith.addf %51, %20 : vector<8x32xf32>
    %c0_34 = arith.constant 0 : index
    %c0_35 = arith.constant 0 : index
    %53 = vector.load %arg10[%c0_34, %c0_35] : memref<1x32xf32, #tpu.memory_space<vmem>>, vector<1x32xf32>
    %cst_36 = arith.constant dense<0.000000e+00> : vector<1x8xf32>
    %54 = tpu.matmul %53, %52, %cst_36 {dimension_numbers = #tpu.dot_dimension_numbers<[1], [1], [0], [0], [0, 0, 1, 0], [], []>} : vector<1x32xf32>, vector<8x32xf32>, vector<1x8xf32> -> vector<1x8xf32>
    %c0_37 = arith.constant 0 : index
    %55 = memref.load %arg11[%c0_37] : memref<1xf32, #tpu.memory_space<smem>>
    %56 = vector.broadcast %55 : f32 to vector<1x8xf32>
    %57 = arith.addf %54, %56 : vector<1x8xf32>
    %c0_38 = arith.constant 0 : index
    %c0_39 = arith.constant 0 : index
    %c0_40 = arith.constant 0 : index
    %58 = vector.load %arg12[%c0_38, %c0_39, %c0_40] : memref<1x1x8xf32, #tpu.memory_space<vmem>>, vector<1x1x8xf32>
    %59 = vector.shape_cast %58 : vector<1x1x8xf32> to vector<1x8xf32>
    %60 = vector.shape_cast %57 : vector<1x8xf32> to vector<1x1x8xf32>
    tpu.vector_store %arg12[%c0_38, %c0_39, %c0_40], %60 {strides = array<i32>} : memref<1x1x8xf32, #tpu.memory_space<vmem>>, vector<1x1x8xf32>,
    return
  }
  func.func @transform_0(%arg0: i32, %arg1: i32) -> (i32, i32, i32) {
    %c0_i32 = arith.constant 0 : i32
    %c0_i32_0 = arith.constant 0 : i32
    return %arg0, %arg1, %c0_i32 : i32, i32, i32
  }
  func.func @transform_1(%arg0: i32, %arg1: i32) -> (i32, i32) {
    %c0_i32 = arith.constant 0 : i32
    %c0_i32_0 = arith.constant 0 : i32
    %c0_i32_1 = arith.constant 0 : i32
    return %c0_i32, %c0_i32_0 : i32, i32
  }
  func.func @transform_2(%arg0: i32, %arg1: i32) -> (i32, i32) {
    %c0_i32 = arith.constant 0 : i32
    %c0_i32_0 = arith.constant 0 : i32
    %c0_i32_1 = arith.constant 0 : i32
    return %c0_i32, %c0_i32_0 : i32, i32
  }
  func.func @transform_3(%arg0: i32, %arg1: i32) -> (i32, i32, i32) {
    %c0_i32 = arith.constant 0 : i32
    %c0_i32_0 = arith.constant 0 : i32
    %c0_i32_1 = arith.constant 0 : i32
    return %arg0, %c0_i32, %c0_i32_0 : i32, i32, i32
  }
  func.func @transform_4(%arg0: i32, %arg1: i32) -> (i32, i32, i32) {
    %c0_i32 = arith.constant 0 : i32
    %c0_i32_0 = arith.constant 0 : i32
    return %arg0, %arg1, %c0_i32 : i32, i32, i32
  }
  func.func @transform_5(%arg0: i32, %arg1: i32) -> (i32, i32) {
    %c0_i32 = arith.constant 0 : i32
    %c0_i32_0 = arith.constant 0 : i32
    %c0_i32_1 = arith.constant 0 : i32
    return %c0_i32, %c0_i32_0 : i32, i32
  }
  func.func @transform_6(%arg0: i32, %arg1: i32) -> (i32, i32, i32) {
    %c0_i32 = arith.constant 0 : i32
    %c0_i32_0 = arith.constant 0 : i32
    %c0_i32_1 = arith.constant 0 : i32
    %c0_i32_2 = arith.constant 0 : i32
    return %c0_i32, %c0_i32_0, %c0_i32_1 : i32, i32, i32
  }
  func.func @transform_7(%arg0: i32, %arg1: i32) -> (i32, i32, i32) {
    %c0_i32 = arith.constant 0 : i32
    %c0_i32_0 = arith.constant 0 : i32
    %c0_i32_1 = arith.constant 0 : i32
    %c0_i32_2 = arith.constant 0 : i32
    return %c0_i32, %c0_i32_0, %c0_i32_1 : i32, i32, i32
  }
  func.func @transform_8(%arg0: i32, %arg1: i32) -> (i32, i32) {
    %c0_i32 = arith.constant 0 : i32
    %c0_i32_0 = arith.constant 0 : i32
    %c0_i32_1 = arith.constant 0 : i32
    return %c0_i32, %c0_i32_0 : i32, i32
  }
  func.func @transform_9(%arg0: i32, %arg1: i32) -> i32 {
    %c0_i32 = arith.constant 0 : i32
    %c0_i32_0 = arith.constant 0 : i32
    return %c0_i32 : i32
  }
  func.func @transform_10(%arg0: i32, %arg1: i32) -> (i32, i32, i32) {
    %c0_i32 = arith.constant 0 : i32
    %c0_i32_0 = arith.constant 0 : i32
    return %arg0, %c0_i32, %arg1 : i32, i32, i32
  }
}

module attributes {stable_mosaic.version = 11 : i64} {
  func.func @_denoise_kernel(%arg0: i32, %arg1: i32, %arg2: memref<1x8x1xf32, #tpu.memory_space<vmem>>, %arg3: memref<1x32xf32, #tpu.memory_space<vmem>>, %arg4: memref<1x32xf32, #tpu.memory_space<vmem>>, %arg5: memref<1x1x32xf32, #tpu.memory_space<vmem>>, %arg6: memref<1x8x32xf32, #tpu.memory_space<vmem>>, %arg7: memref<32x32xf32, #tpu.memory_space<vmem>>, %arg8: memref<2x32x32xf32, #tpu.memory_space<vmem>>, %arg9: memref<2x1x32xf32, #tpu.memory_space<vmem>>, %arg10: memref<1x32xf32, #tpu.memory_space<vmem>>, %arg11: memref<1xf32, #tpu.memory_space<smem>>, %arg12: memref<1x1x8xf32, #tpu.memory_space<vmem>>) attributes {dimension_semantics = [#tpu.dimension_semantics<parallel>, #tpu.dimension_semantics<parallel>], iteration_bounds = array<i64: 2, 1>, scalar_prefetch = 0 : i64, scratch_operands = 0 : i64, tpu.core_type = #tpu.core_type<tc>, window_params = [{transform_indices = @transform_0, window_bounds = array<i64: 1, 8, 1>}, {pipeline_mode = #tpu.pipeline_mode<synchronous>, transform_indices = @transform_1, window_bounds = array<i64: 1, 32>}, {pipeline_mode = #tpu.pipeline_mode<synchronous>, transform_indices = @transform_2, window_bounds = array<i64: 1, 32>}, {transform_indices = @transform_3, window_bounds = array<i64: 1, 1, 32>}, {transform_indices = @transform_4, window_bounds = array<i64: 1, 8, 32>}, {pipeline_mode = #tpu.pipeline_mode<synchronous>, transform_indices = @transform_5, window_bounds = array<i64: 32, 32>}, {pipeline_mode = #tpu.pipeline_mode<synchronous>, transform_indices = @transform_6, window_bounds = array<i64: 2, 32, 32>}, {pipeline_mode = #tpu.pipeline_mode<synchronous>, transform_indices = @transform_7, window_bounds = array<i64: 2, 1, 32>}, {pipeline_mode = #tpu.pipeline_mode<synchronous>, transform_indices = @transform_8, window_bounds = array<i64: 1, 32>}, {transform_indices = @transform_9, window_bounds = array<i64: 1>}, {transform_indices = @transform_10, window_bounds = array<i64: 1, 1, 8>}]} {
    %c0 = arith.constant 0 : index
    %c0_0 = arith.constant 0 : index
    %c0_1 = arith.constant 0 : index
    %0 = vector.load %arg2[%c0, %c0_0, %c0_1] : memref<1x8x1xf32, #tpu.memory_space<vmem>>, vector<1x8x1xf32>
    %1 = vector.shape_cast %0 : vector<1x8x1xf32> to vector<8x1xf32>
    %c0_2 = arith.constant 0 : index
    %c0_3 = arith.constant 0 : index
    %2 = vector.load %arg3[%c0_2, %c0_3] : memref<1x32xf32, #tpu.memory_space<vmem>>, vector<1x32xf32>
    %3 = vector.broadcast %1 : vector<8x1xf32> to vector<8x32xf32>
    %4 = vector.broadcast %2 : vector<1x32xf32> to vector<8x32xf32>
    %5 = arith.mulf %3, %4 : vector<8x32xf32>
    %c0_4 = arith.constant 0 : index
    %c0_5 = arith.constant 0 : index
    %6 = vector.load %arg4[%c0_4, %c0_5] : memref<1x32xf32, #tpu.memory_space<vmem>>, vector<1x32xf32>
    %7 = vector.broadcast %6 : vector<1x32xf32> to vector<8x32xf32>
    %8 = arith.addf %5, %7 : vector<8x32xf32>
    %9 = math.sin %8 : vector<8x32xf32>
    %cst = arith.constant 0.176776692 : f32
    %10 = vector.broadcast %cst : f32 to vector<8x32xf32>
    %11 = arith.mulf %9, %10 : vector<8x32xf32>
    %c0_6 = arith.constant 0 : index
    %c0_7 = arith.constant 0 : index
    %c0_8 = arith.constant 0 : index
    %12 = vector.load %arg6[%c0_6, %c0_7, %c0_8] : memref<1x8x32xf32, #tpu.memory_space<vmem>>, vector<1x8x32xf32>
    %13 = vector.shape_cast %12 : vector<1x8x32xf32> to vector<8x32xf32>
    %c0_9 = arith.constant 0 : index
    %c0_10 = arith.constant 0 : index
    %14 = vector.load %arg7[%c0_9, %c0_10] : memref<32x32xf32, #tpu.memory_space<vmem>>, vector<32x32xf32>
    %cst_11 = arith.constant dense<0.000000e+00> : vector<8x32xf32>
    %15 = tpu.matmul %13, %14, %cst_11 {dimension_numbers = #tpu.dot_dimension_numbers<[1], [0], [0], [1], [0, 0, 1, 1], [], []>} : vector<8x32xf32>, vector<32x32xf32>, vector<8x32xf32> -> vector<8x32xf32>
    %c0_12 = arith.constant 0 : index
    %c0_13 = arith.constant 0 : index
    %c0_14 = arith.constant 0 : index
    %16 = vector.load %arg5[%c0_12, %c0_13, %c0_14] : memref<1x1x32xf32, #tpu.memory_space<vmem>>, vector<1x1x32xf32>
    %17 = vector.shape_cast %16 : vector<1x1x32xf32> to vector<1x32xf32>
    %18 = vector.broadcast %17 : vector<1x32xf32> to vector<8x32xf32>
    %19 = arith.addf %11, %18 : vector<8x32xf32>
    %20 = arith.addf %19, %15 : vector<8x32xf32>
    %c0_15 = arith.constant 0 : index
    %c0_16 = arith.constant 0 : index
    %c0_17 = arith.constant 0 : index
    %21 = vector.load %arg8[%c0_15, %c0_16, %c0_17] : memref<2x32x32xf32, #tpu.memory_space<vmem>>, vector<1x32x32xf32>
    %22 = vector.shape_cast %21 : vector<1x32x32xf32> to vector<32x32xf32>
    %cst_18 = arith.constant dense<0.000000e+00> : vector<8x32xf32>
    %23 = tpu.matmul %20, %22, %cst_18 {dimension_numbers = #tpu.dot_dimension_numbers<[1], [0], [0], [1], [0, 0, 1, 1], [], []>} : vector<8x32xf32>, vector<32x32xf32>, vector<8x32xf32> -> vector<8x32xf32>
    %c0_19 = arith.constant 0 : index
    %c0_20 = arith.constant 0 : index
    %c0_21 = arith.constant 0 : index
    %24 = vector.load %arg9[%c0_19, %c0_20, %c0_21] : memref<2x1x32xf32, #tpu.memory_space<vmem>>, vector<1x1x32xf32>
    %25 = vector.shape_cast %24 : vector<1x1x32xf32> to vector<1x32xf32>
    %26 = vector.broadcast %25 : vector<1x32xf32> to vector<8x32xf32>
    %27 = arith.addf %23, %26 : vector<8x32xf32>
    %cst_22 = arith.constant 5.000000e-01 : f32
    %28 = vector.broadcast %cst_22 : f32 to vector<8x32xf32>
    %29 = arith.mulf %28, %27 : vector<8x32xf32>
    %cst_23 = arith.constant 0.707106769 : f32
    %30 = vector.broadcast %cst_23 : f32 to vector<8x32xf32>
    %31 = arith.mulf %27, %30 : vector<8x32xf32>
    %32 = math.erf %31 : vector<8x32xf32>
    %cst_24 = arith.constant 1.000000e+00 : f32
    %33 = vector.broadcast %cst_24 : f32 to vector<8x32xf32>
    %34 = arith.addf %33, %32 : vector<8x32xf32>
    %35 = arith.mulf %29, %34 : vector<8x32xf32>
    %36 = arith.addf %35, %20 : vector<8x32xf32>
    %c1 = arith.constant 1 : index
    %c0_25 = arith.constant 0 : index
    %c0_26 = arith.constant 0 : index
    %37 = vector.load %arg8[%c1, %c0_25, %c0_26] : memref<2x32x32xf32, #tpu.memory_space<vmem>>, vector<1x32x32xf32>
    %38 = vector.shape_cast %37 : vector<1x32x32xf32> to vector<32x32xf32>
    %cst_27 = arith.constant dense<0.000000e+00> : vector<8x32xf32>
    %39 = tpu.matmul %36, %38, %cst_27 {dimension_numbers = #tpu.dot_dimension_numbers<[1], [0], [0], [1], [0, 0, 1, 1], [], []>} : vector<8x32xf32>, vector<32x32xf32>, vector<8x32xf32> -> vector<8x32xf32>
    %c1_28 = arith.constant 1 : index
    %c0_29 = arith.constant 0 : index
    %c0_30 = arith.constant 0 : index
    %40 = vector.load %arg9[%c1_28, %c0_29, %c0_30] : memref<2x1x32xf32, #tpu.memory_space<vmem>>, vector<1x1x32xf32>
    %41 = vector.shape_cast %40 : vector<1x1x32xf32> to vector<1x32xf32>
    %42 = vector.broadcast %41 : vector<1x32xf32> to vector<8x32xf32>
    %43 = arith.addf %39, %42 : vector<8x32xf32>
    %cst_31 = arith.constant 5.000000e-01 : f32
    %44 = vector.broadcast %cst_31 : f32 to vector<8x32xf32>
    %45 = arith.mulf %44, %43 : vector<8x32xf32>
    %cst_32 = arith.constant 0.707106769 : f32
    %46 = vector.broadcast %cst_32 : f32 to vector<8x32xf32>
    %47 = arith.mulf %43, %46 : vector<8x32xf32>
    %48 = math.erf %47 : vector<8x32xf32>
    %cst_33 = arith.constant 1.000000e+00 : f32
    %49 = vector.broadcast %cst_33 : f32 to vector<8x32xf32>
    %50 = arith.addf %49, %48 : vector<8x32xf32>
    %51 = arith.mulf %45, %50 : vector<8x32xf32>
    %52 = arith.addf %51, %20 : vector<8x32xf32>
    %c0_34 = arith.constant 0 : index
    %c0_35 = arith.constant 0 : index
    %53 = vector.load %arg10[%c0_34, %c0_35] : memref<1x32xf32, #tpu.memory_space<vmem>>, vector<1x32xf32>
    %cst_36 = arith.constant dense<0.000000e+00> : vector<1x8xf32>
    %54 = tpu.matmul %53, %52, %cst_36 {dimension_numbers = #tpu.dot_dimension_numbers<[1], [1], [0], [0], [0, 0, 1, 0], [], []>} : vector<1x32xf32>, vector<8x32xf32>, vector<1x8xf32> -> vector<1x8xf32>
    %c0_37 = arith.constant 0 : index
    %55 = memref.load %arg11[%c0_37] : memref<1xf32, #tpu.memory_space<smem>>
    %56 = vector.broadcast %55 : f32 to vector<1x8xf32>
    %57 = arith.addf %54, %56 : vector<1x8xf32>
    %c0_38 = arith.constant 0 : index
    %c0_39 = arith.constant 0 : index
    %c0_40 = arith.constant 0 : index
    %58 = vector.load %arg12[%c0_38, %c0_39, %c0_40] : memref<1x1x8xf32, #tpu.memory_space<vmem>>, vector<1x1x8xf32>
    %59 = vector.shape_cast %58 : vector<1x1x8xf32> to vector<1x8xf32>
    %60 = vector.shape_cast %57 : vector<1x8xf32> to vector<1x1x8xf32>
    tpu.vector_store %arg12[%c0_38, %c0_39, %c0_40], %60 {strides = array<i32>} : memref<1x1x8xf32, #tpu.memory_space<vmem>>, vector<1x1x8xf32>,
    return
  }
  func.func @transform_0(%arg0: i32, %arg1: i32) -> (i32, i32, i32) {
    %c0_i32 = arith.constant 0 : i32
    %c0_i32_0 = arith.constant 0 : i32
    return %arg0, %arg1, %c0_i32 : i32, i32, i32
  }
  func.func @transform_1(%arg0: i32, %arg1: i32) -> (i32, i32) {
    %c0_i32 = arith.constant 0 : i32
    %c0_i32_0 = arith.constant 0 : i32
    %c0_i32_1 = arith.constant 0 : i32
    return %c0_i32, %c0_i32_0 : i32, i32
  }
  func.func @transform_2(%arg0: i32, %arg1: i32) -> (i32, i32) {
    %c0_i32 = arith.constant 0 : i32
    %c0_i32_0 = arith.constant 0 : i32
    %c0_i32_1 = arith.constant 0 : i32
    return %c0_i32, %c0_i32_0 : i32, i32
  }
  func.func @transform_3(%arg0: i32, %arg1: i32) -> (i32, i32, i32) {
    %c0_i32 = arith.constant 0 : i32
    %c0_i32_0 = arith.constant 0 : i32
    %c0_i32_1 = arith.constant 0 : i32
    return %arg0, %c0_i32, %c0_i32_0 : i32, i32, i32
  }
  func.func @transform_4(%arg0: i32, %arg1: i32) -> (i32, i32, i32) {
    %c0_i32 = arith.constant 0 : i32
    %c0_i32_0 = arith.constant 0 : i32
    return %arg0, %arg1, %c0_i32 : i32, i32, i32
  }
  func.func @transform_5(%arg0: i32, %arg1: i32) -> (i32, i32) {
    %c0_i32 = arith.constant 0 : i32
    %c0_i32_0 = arith.constant 0 : i32
    %c0_i32_1 = arith.constant 0 : i32
    return %c0_i32, %c0_i32_0 : i32, i32
  }
  func.func @transform_6(%arg0: i32, %arg1: i32) -> (i32, i32, i32) {
    %c0_i32 = arith.constant 0 : i32
    %c0_i32_0 = arith.constant 0 : i32
    %c0_i32_1 = arith.constant 0 : i32
    %c0_i32_2 = arith.constant 0 : i32
    return %c0_i32, %c0_i32_0, %c0_i32_1 : i32, i32, i32
  }
  func.func @transform_7(%arg0: i32, %arg1: i32) -> (i32, i32, i32) {
    %c0_i32 = arith.constant 0 : i32
    %c0_i32_0 = arith.constant 0 : i32
    %c0_i32_1 = arith.constant 0 : i32
    %c0_i32_2 = arith.constant 0 : i32
    return %c0_i32, %c0_i32_0, %c0_i32_1 : i32, i32, i32
  }
  func.func @transform_8(%arg0: i32, %arg1: i32) -> (i32, i32) {
    %c0_i32 = arith.constant 0 : i32
    %c0_i32_0 = arith.constant 0 : i32
    %c0_i32_1 = arith.constant 0 : i32
    return %c0_i32, %c0_i32_0 : i32, i32
  }
  func.func @transform_9(%arg0: i32, %arg1: i32) -> i32 {
    %c0_i32 = arith.constant 0 : i32
    %c0_i32_0 = arith.constant 0 : i32
    return %c0_i32 : i32
  }
  func.func @transform_10(%arg0: i32, %arg1: i32) -> (i32, i32, i32) {
    %c0_i32 = arith.constant 0 : i32
    %c0_i32_0 = arith.constant 0 : i32
    return %arg0, %c0_i32, %arg1 : i32, i32, i32
  }
}

</mosaic_0001>

<bundles_post_ra>
// kernel: tpu_custom_call.1
= control target key start
LH: loop header
LB: loop body
LE: loop exit
PB: predicated region body
PF: predicated region fallthrough
CT: control target
= control target key end

     0   :  { %s1537_s0 = inlined_call_operand.vmem [shape: f32[2,8,1], index: 0, kind: input, shape index: {}]   ;;  %s1538_s1 = inlined_call_operand.vmem [shape: f32[1,32], index: 1, kind: input, shape index: {}]   ;;  %s1539_s2 = inlined_call_operand.vmem [shape: f32[1,32], index: 2, kind: input, shape index: {}]   ;;  %s1540_s3 = inlined_call_operand.vmem [shape: f32[2,1,32], index: 3, kind: input, shape index: {}]   ;;  %s1541_s4 = inlined_call_operand.vmem [shape: f32[2,8,32], index: 4, kind: input, shape index: {}]   ;;  %s1542_s5 = inlined_call_operand.hbm [shape: f32[32,32], index: 5, kind: input, shape index: {}]   ;;  %s1543_s6 = inlined_call_operand.hbm [shape: f32[2,32,32], index: 6, kind: input, shape index: {}]   ;;  %s1544_s7 = inlined_call_operand.vmem [shape: f32[2,1,32], index: 7, kind: input, shape index: {}]   ;;  %s1545_s8 = inlined_call_operand.vmem [shape: f32[1,32], index: 8, kind: input, shape index: {}]   ;;  %s1546_s9 = inlined_call_operand.<no memory space> [shape: f32[1], index: 9, kind: input, shape index: {}]   ;;  %s1547_s10 = inlined_call_operand.hbm [shape: f32[2,1,8], index: 10, kind: output, shape index: {}]  }
   0x1   :  { %15 = sst [smem:[#allocation2]] %s1546_s9 }
   0x2   :  { %16 = vsyncpa [#allocation4], 0 }
   0x3   :  { %17 = vsyncpa [#allocation7], 0 }
   0x4   :  { %18 = vsyncpa [#allocation5], 0 }
   0x5   :  { %20 = vsyncpa [#allocation5 + $0x1], 0  ;;  %s1311_s15 = smov 0   ;;  %s1313_s16 = smov 0  }
   0x6   :  { %s1315_s17 = smov 0   ;;  %s1317_s18 = smov 0  }
   0x7   :  { %s1319_s19 = smov 0   ;;  %s1321_s20 = smov 0  }
   0x8 LB: > { %1550 = sst [smem:[#allocation12_spill]] %s1236_s19  ;;  %s975_s9 = sadd.s32 4294967295, %s1240_s20   ;;  %s1240_s20 = sphi %s1321_s20, %s26_s20   ;;  %s1236_s19 = sphi %s1319_s19, %s1557_s19   ;;  %s1232_s18 = sphi %s1317_s18, %s1556_s18   ;;  %s1228_s17 = sphi %s1315_s17, %s1560_s17   ;;  %s1224_s16 = sphi %s1313_s16, %s1559_s16   ;;  %s1220_s15 = sphi %s1311_s15, %s1558_s15  }
   0x9   : > { %s976_s21 = sadd.s32 4294967294, %s1240_s20   ;;  %s38_s22 = sadd.s32 1, %s1236_s19 }
   0xa   : > { %s276_s23 = sadd.s32 1, %s1228_s17  ;;  %p40_p0 = scmp.ge.s32.totalorder %s38_s22, 2 }
   0xb   : > { %p286_p1 = scmp.ne.s32.totalorder %s1228_s17, %s1224_s16  ;;  %p287_p2 = scmp.eq.s32.totalorder %s975_s9, 1 }
   0xc   : > { %p292_p3 = scmp.ne.s32.totalorder %s1224_s16, %s1220_s15  ;;  %s1562_s22 = smov (%p40_p0, %s38_s22), 0 }
   0xd   : > { %1551 = sst [smem:[#allocation13_spill]] %s1562_s22  ;;  %p1351_p4 = por %p287_p2, %p286_p1 }
   0xe   : > { %p293_p5 = scmp.eq.s32.totalorder %s976_s21, 1  ;;  %s271_s25 = ssub.s32 %s1236_s19, %s1562_s22 }
   0xf   : > { %p977_p6 = scmp.ge.s32.totalorder %s1240_s20, 1  ;;  %p274_p7 = scmp.eq.s32.totalorder %s271_s25, 0 }
  0x10   : > { %p1358_p8 = por %p293_p5, %p292_p3  ;;  %p300_p9 = scmp.lt.s32.totalorder %s1240_s20, 3 }
  0x11   : > { %s1364_s27 = scalar_select %p274_p7, %s1228_s17, %s276_s23  }
  0x12   : > { %p1366_p10 = pnand %p977_p6, %p300_p9  ;;  %p1370_p11 = scmp.eq.s32.totalorder %s975_s9, 0 }
  0x13   : > { %s317_s12 = sshll.u32 %s1542_s5, 4  ;;  %s1242_s13 = smov [#allocation3]   ;;  %s318_s12 = int_to_ptr.hbm [resolvable:$true] %s317_s12 }
  0x14   : > { %p1009_p12 = pneg %p1366_p10  ;;  %s319_s14 = sshll.u32 %s1242_s13, 4  ;;  %s320_s14 = int_to_ptr.vmem [resolvable:$true] %s319_s14 }
  0x15   : > { %s331_s9 = sshll.u32 %s1543_s6, 4  ;;  %s1243_s25 = smov 128   ;;  %s332_s9 = int_to_ptr.hbm [resolvable:$true] %s331_s9 }
  0x16   : > { %p1010_p13 = pnand %p1370_p11, %p1009_p12  ;;  %s1244_s22 = smov 8  }
  0x17   : > { %s1245_s19 = smov [#allocation6]   ;;  %384 = sbr.rel (%p1366_p10) target bundleno = 767 (0x2ff), region = 60 }
  0x18   : > { %1012 = dma.hbm_to_vmem [thread:$0]  (!%p1010_p13), %s318_s12, 512, %s320_s14, [#allocation4], %s1243_s25, %s1243_s25, %s1244_s22  }
  0x19   : > { %s333_s30 = sshll.u32 %s1245_s19, 4  ;;  %s334_s30 = int_to_ptr.vmem [resolvable:$true] %s333_s30 }
  0x1a   : > { %1015 = dma.hbm_to_vmem [thread:$0]  (!%p1010_p13), %s332_s9, 1024, %s334_s30, [#allocation7], %s1243_s25, %s1243_s25, %s1244_s22  }
  0x1c   : > { %1207 = dma.done.wait (%p1370_p11), [#allocation4], 512  }
  0x1d   : > { %1209 = vsyncadd (%p1370_p11), [#allocation4], 4294966784 }
  0x1e   : > { %1211 = dma.done.wait (%p1370_p11), [#allocation7], 1024  }
  0x1f   : > { %1213 = vsyncadd (%p1370_p11), [#allocation7], 4294966272  ;;  %p439_p0 = scmp.lt.s32.totalorder %s1232_s18, 1  ;;  %v1246_v0 = vmov 0   ;;  %v632_v2 = vld [vmem:[#allocation3 + $0x18] sm:$0xff]  ;;  %v631_v3 = vld [vmem:[#allocation3 + $0x10] sm:$0xff]  ;;  %s858_s11 = scalar_lea.hbm %s1547_s10, %s1232_s18 }
  0x20   : > { %1084 = vset.pattern.permute.xlu0 %v1246_v0  ;;  %649 = vmatpush.msra.mxu0 %v632_v2  ;;  %v630_v4 = vld [vmem:[#allocation3 + $0x8] sm:$0xff]  ;;  %v629_v5 = vld [vmem:[#allocation3] sm:$0xff]  ;;  %vm633_vm0 = vcmask 261120   ;;  %v666_v11 = vld [vmem:[#allocation6 + $0x18] sm:$0xff]  ;;  %v1247_v25 = vmov 683565275  }
  0x21   : > { %s1397_s19 = scalar_select %p439_p0, %s1232_s18, 1  ;;  %v1085_v7 = vld [vmem:[%s1538_s1] ss:$0 sm:$0xff]  ;;  %v665_v12 = vld [vmem:[#allocation6 + $0x10] sm:$0xff]  ;;  %686 = vmatpush.msra.mxu1 %v666_v11  ;;  %v1248_v27 = vmov 2475754826  }
  0x22   : > { %650 = vmatpush.msra.mxu0 %v631_v3  ;;  %v1086_v8 = vld [vmem:[%s1539_s2] ss:$0 sm:$0xff]  ;;  %v1249_v30 = vmov 2131351028   ;;  %v1250_v33 = vmov 2102212464  }
  0x23   : > { %s984_s22 = sshll.u32 %s1397_s19, 3  ;;  %s448_s9 = scalar_lea.vmem %s1540_s3, %s1397_s19  ;;  %687 = vmatpush.msra.mxu1 %v665_v12  ;;  %v1251_v36 = vmov 920167782   ;;  %v1252_v39 = vmov 1326507024  }
  0x24   : > { %s445_s12 = scalar_lea.vmem %s1537_s0, %s984_s22  ;;  %s455_s14 = scalar_lea.vmem %s1541_s4, %s984_s22  ;;  %651 = vmatpush.msra.mxu0 %v630_v4 }
  0x25   : > { %v456_v1 = vld [vmem:[%s445_s12] sm:$0xff]  ;;  %s437_s25 = sand.u32 1, %s1224_s16   ;;  %s862_s29 = sshll.u32 %s858_s11, 4  ;;  %s863_s29 = int_to_ptr.hbm [resolvable:$true] %s862_s29 }
  0x26   : > { %460 = vperm.xlu0 %1084, %v456_v1   ;;  %v628_v6 = vld [vmem:[%s455_s14] sm:$0xff]  ;;  %652 = vmatpush.msra.mxu0 %v629_v5  ;;  %s438_s22 = scalar_lea.vmem [#allocation8], %s437_s25  ;;  %s849_s13 = scalar_lea.sflag [#allocation5], %s437_s25 }
  0x27   : > { %989 = vmatmul.msk.f32.vlgmr.msra.gmra.mxu0 %vm633_vm0, %v628_v6  ;;  %s860_s12 = sshll.u32 %s438_s22, 4  ;;  %s1168_s19 = sshra.s32 %s863_s29, 4  ;;  %s861_s12 = int_to_ptr.vmem [resolvable:$true] %s860_s12  ;;  %s1169_s19 = int_to_ptr.hbm [resolvable:$true] %s1168_s19 }
  0x28   : > { %s1170_s14 = scalar_lea.hbm %s1169_s19, 1  ;;  %s1174_s23 = scalar_lea.hbm %s1547_s10, 2 }
  0x29   : > { %p1171_p1 = scmp.ne.s32.totalorder %s1169_s19, %s1170_s14  ;;  %p1175_p5 = scmp.lt.s32.totalorder %s1169_s19, %s1547_s10 }
  0x2a   : > { %p1176_p6 = scmp.lt.s32.totalorder %s1174_s23, %s1170_s14 }
  0x2b   : > { %p1172_p2 = pnand %p1171_p1, %p1351_p4 }
  0x2c   : > { %p1177_p7 = por %p1176_p6, %p1175_p5 }
  0x2d   : > { %p1173_p3 = pneg %p1172_p2 }
  0x2f   : > { %p1178_p9 = pnand %p1177_p7, %p1173_p3 }
  0x98   : > { %v461_v9 = vpop.permute.xlu0 %460 }
  0x99   : > { %v466_v10 = vmul.f32 %v1085_v7, %v461_v9 }
  0x9b   : > { %v1417_v13 = vadd.f32 %v1086_v8, %v466_v10 }
  0x9d   : > { %v475_v14 = vand.u32 2139095040, %v1417_v13  ;;  %v472_v17 = vand.u32 2147483647, %v1417_v13  ;;  %vm474_vm13 = vcmp.lt.s32.totalorder %v1417_v13, 0 }
  0x9f   : > { %v476_v15 = vshrl.u32 %v475_v14, 23  ;;  %v479_v19 = vand.u32 8388607, %v472_v17  ;;  %vm473_vm14 = vcmp.le.f32.partialorder %v472_v17, 0.7853982 }
  0xa1   : > { %v986_v16 = vadd.s32 4294967169, %v476_v15  ;;  %v480_v23 = vor.u32 8388608, %v479_v19 }
  0xa3   : > { %v482_v18 = vadd.s32 1, %v986_v16  ;;  %v1434_v46 = vshll.u32 %v480_v23, 8 }
  0xa5   : > { %vm483_vm1 = vcmp.gt.s32.totalorder %v482_v18, 0  ;;  %v521_v55 = vand.u32 65535, %v1434_v46  ;;  %v522_v60 = vshrl.u32 %v1434_v46, 16 }
  0xa6   : > { %v484_v20 = vsel %vm483_vm1, %v482_v18, 0 }
  0xa7   : > { %v486_v21 = vand.u32 31, %v484_v20  ;;  %v1425_v24 = vshrl.u32 %v484_v20, 5 }
  0xa9   : > { %v1423_v22 = vsub.s32 32, %v486_v21  ;;  %v489_v26 = vshll.u32 %v1247_v25, %v486_v21  ;;  %v492_v28 = vshll.u32 %v1248_v27, %v486_v21  ;;  %v495_v32 = vshll.u32 %v1249_v30, %v486_v21 }
  0xaa   : > { %v498_v35 = vshll.u32 %v1250_v33, %v486_v21  ;;  %v501_v38 = vshll.u32 %v1251_v36, %v486_v21  ;;  %vm504_vm2 = vcmp.lt.s32.totalorder %v1425_v24, 1  ;;  %vm507_vm3 = vcmp.lt.s32.totalorder %v1425_v24, 4 }
  0xab   : > { %v490_v29 = vshrl.u32 %v1248_v27, %v1423_v22  ;;  %v493_v31 = vshrl.u32 %v1249_v30, %v1423_v22  ;;  %v496_v34 = vshrl.u32 %v1250_v33, %v1423_v22  ;;  %v499_v37 = vshrl.u32 %v1251_v36, %v1423_v22 }
  0xac   : > { %v502_v40 = vshrl.u32 %v1252_v39, %v1423_v22  ;;  %vm506_vm4 = vcmp.lt.s32.totalorder %v1425_v24, 3  ;;  %vm505_vm5 = vcmp.lt.s32.totalorder %v1425_v24, 2  ;;  %v488_v19 = vshrl.u32 %v1247_v25, %v1423_v22 }
  0xad   : > { %v491_v41 = vor.u32 %v490_v29, %v489_v26  ;;  %v494_v42 = vor.u32 %v493_v31, %v492_v28  ;;  %v497_v43 = vor.u32 %v496_v34, %v495_v32  ;;  %v500_v44 = vor.u32 %v499_v37, %v498_v35 }
  0xae   : > { %v503_v45 = vor.u32 %v502_v40, %v501_v38 }
  0xaf   : > { %v512_v47 = vsel %vm504_vm2, %v491_v41, %v494_v42  ;;  %v516_v48 = vsel %vm504_vm2, %v494_v42, %v497_v43  ;;  %v513_v49 = vsel %vm507_vm3, %v500_v44, 920167782  ;;  %v509_v12 = vsel %vm507_vm3, %v497_v43, 2102212464 }
  0xb0   : > { %v517_v50 = vsel %vm507_vm3, %v503_v45, 1326507024  ;;  %v514_v51 = vsel %vm506_vm4, %v497_v43, %v513_v49  ;;  %v508_v29 = vsel %vm504_vm2, %v488_v19, %v491_v41  ;;  %v510_v30 = vsel %vm506_vm4, %v494_v42, %v509_v12 }
  0xb1   : > { %v518_v52 = vsel %vm506_vm4, %v500_v44, %v517_v50  ;;  %v515_v53 = vsel %vm505_vm5, %v512_v47, %v514_v51  ;;  %v511_v22 = vsel %vm505_vm5, %v508_v29, %v510_v30  ;;  %vm615_vm3 = vweird.f32 %v1417_v13  ;;  %v1087_v30 = vld [vmem:[%s448_s9] ss:$0 sm:$0xff]  ;;  %s818_s9 = sld [smem:[#allocation2]] }
  0xb2   : > { %v519_v54 = vsel %vm505_vm5, %v516_v48, %v518_v52  ;;  %v545_v58 = vand.u32 65535, %v515_v53  ;;  %v546_v59 = vshrl.u32 %v515_v53, 16  ;;  %v565_v37 = vmul.u32 %v1434_v46, %v511_v22 }
  0xb3   : > { %v523_v56 = vand.u32 65535, %v519_v54  ;;  %v524_v57 = vshrl.u32 %v519_v54, 16 }
  0xb4   : > { %v548_v62 = vmul.u32 %v546_v59, %v521_v55  ;;  %v549_v1 = vmul.u32 %v545_v58, %v522_v60  ;;  %v547_v4 = vmul.u32 %v545_v58, %v521_v55  ;;  %v550_v7 = vmul.u32 %v546_v59, %v522_v60  ;;  %v664_v59 = vld [vmem:[#allocation6 + $0x8] sm:$0xff] }
  0xb5   : > { %v526_v61 = vmul.u32 %v524_v57, %v521_v55  ;;  %v527_v63 = vmul.u32 %v523_v56, %v522_v60  ;;  %v525_v2 = vmul.u32 %v523_v56, %v521_v55  ;;  %v528_v6 = vmul.u32 %v524_v57, %v522_v60  ;;  %v663_v60 = vld [vmem:[#allocation6] sm:$0xff]  ;;  %688 = vmatpush.msra.mxu1 %v664_v59 }
  0xb6   : > { %v551_v5 = vshll.u32 %v548_v62, 16  ;;  %v553_v9 = vshll.u32 %v549_v1, 16  ;;  %v552_v27 = vshrl.u32 %v548_v62, 16  ;;  %v554_v33 = vshrl.u32 %v549_v1, 16 }
  0xb7   : > { %v529_v3 = vshll.u32 %v526_v61, 16  ;;  %v531_v8 = vshll.u32 %v527_v63, 16  ;;  %v530_v23 = vshrl.u32 %v526_v61, 16  ;;  %v532_v31 = vshrl.u32 %v527_v63, 16  ;;  %689 = vmatpush.msra.mxu1 %v663_v60 }
  0xb8   : > { %vm555_vm7 = vc.u32 %v547_v4, %v551_v5  ;;  %v557_v11 = vadd.s32 %v551_v5, %v547_v4 }
  0xb9   : > { %vm533_vm6 = vc.u32 %v525_v2, %v529_v3  ;;  %v535_v10 = vadd.s32 %v529_v3, %v525_v2  ;;  %v556_v15 = vsel %vm555_vm7, 1, %v1246_v0 }
  0xba   : > { %v534_v14 = vsel %vm533_vm6, 1, %v1246_v0  ;;  %v558_v18 = vadd.s32 %v556_v15, %v550_v7  ;;  %vm559_vm9 = vc.u32 %v557_v11, %v553_v9  ;;  %v561_v35 = vadd.s32 %v557_v11, %v553_v9 }
  0xbb   : > { %v536_v16 = vadd.s32 %v534_v14, %v528_v6  ;;  %vm537_vm8 = vc.u32 %v535_v10, %v531_v8  ;;  %v560_v21 = vsel %vm559_vm9, 1, %v1246_v0 }
  0xbc   : > { %v538_v20 = vsel %vm537_vm8, 1, %v1246_v0  ;;  %v562_v28 = vadd.s32 %v560_v21, %v558_v18 }
  0xbd   : > { %v540_v26 = vadd.s32 %v538_v20, %v536_v16 }
  0xbe   : > { %v563_v34 = vadd.s32 %v562_v28, %v552_v27 }
  0xbf   : > { %v541_v32 = vadd.s32 %v540_v26, %v530_v23 }
  0xc0   : > { %v564_v0 = vadd.s32 %v563_v34, %v554_v33  ;;  %v654_v33 = vpop.f32.mrf.mxu0 }
  0xc1   : > { %v542_v25 = vadd.s32 %v541_v32, %v532_v31 }
  0xc2   : > { %v568_v36 = vadd.s32 1, %v564_v0 }
  0xc3   : > { %vm567_vm10 = vc.u32 %v542_v25, %v561_v35  ;;  %v566_v49 = vadd.s32 %v561_v35, %v542_v25  ;;  %v1088_v25 = vld [vmem:[%s1544_s7] ss:$0 sm:$0xff] }
  0xc4   : > { %v569_v38 = vsel %vm567_vm10, %v568_v36, %v564_v0 }
  0xc5   : > { %v570_v39 = vadd.s32 %v569_v38, %v565_v37 }
  0xc7   : > { %v571_v40 = vadd.s32 536870912, %v570_v39 }
  0xc9   : > { %v572_v41 = vshrl.u32 %v571_v40, 30 }
  0xcb   : > { %v573_v43 = vshll.u32 %v572_v41, 30  ;;  %v596_v1 = vsub.s32 4, %v572_v41 }
  0xcd   : > { %v574_v42 = vsub.s32 %v570_v39, %v573_v43  ;;  %v597_v6 = vsel %vm474_vm13, %v596_v1, %v572_v41 }
  0xce   : > { %v599_v9 = vsel %vm473_vm14, 0, %v597_v6 }
  0xcf   : > { %vm575_vm11 = vcmp.lt.s32.totalorder %v574_v42, 0  ;;  %v576_v44 = vsub.s32 0, %v574_v42  ;;  %v616_v15 = vadd.s32 3, %v599_v9 }
  0xd1   : > { %v577_v45 = vsel %vm575_vm11, %v576_v44, %v574_v42  ;;  %v617_v20 = vand.u32 3, %v616_v15 }
  0xd2   : > { %v578_v47 = vclz %v577_v45 }
  0xd3   : > { %vm619_vm15 = vcmp.eq.s32.totalorder %v617_v20, 0  ;;  %vm622_vm1 = vcmp.eq.s32.totalorder %v617_v20, 2  ;;  %vm618_vm2 = vcmp.lt.s32.totalorder %v617_v20, 2 }
  0xd4   : > { %v987_v48 = vadd.s32 4294967294, %v578_v47 }
  0xd6   : > { %vm988_vm12 = vcmp.lt.s32.totalorder %v987_v48, 0 }
  0xd7   : > { %v581_v24 = vsel %vm988_vm12, 0, %v987_v48  ;;  %v743_v48 = vld [vmem:[#allocation6 + $0x38] sm:$0xff]  ;;  %vm846_vm12 = vcmask 57344  }
  0xd8   : > { %v582_v50 = vsub.s32 32, %v581_v24  ;;  %v586_v51 = vsub.s32 4294967266, %v581_v24  ;;  %v583_v52 = vshll.u32 %v574_v42, %v581_v24  ;;  %764 = vmatpush.msra.mxu2 %v743_v48 }
  0xda   : > { %v584_v53 = vshrl.u32 %v566_v49, %v582_v50  ;;  %v587_v54 = vadd.s32 127, %v586_v51  ;;  %v742_v50 = vld [vmem:[#allocation6 + $0x30] sm:$0xff]  ;;  %v741_v51 = vld [vmem:[#allocation6 + $0x28] sm:$0xff] }
  0xdb   : > { %765 = vmatpush.msra.mxu2 %v742_v50 }
  0xdc   : > { %v585_v46 = vor.u32 %v584_v53, %v583_v52  ;;  %v588_v55 = vshll.u32 %v587_v54, 23  ;;  %v740_v53 = vld [vmem:[#allocation6 + $0x20] sm:$0xff] }
  0xdd   : > { %766 = vmatpush.msra.mxu2 %v741_v51 }
  0xde   : > { %v589_v56 = vor.u32 4788187, %v588_v55  ;;  %v592_v58 = vcvt.s32.f32 %v585_v46 }
  0xdf   : > { %767 = vmatpush.msra.mxu2 %v740_v53 }
  0xe0   : > { %v590_v57 = vand.u32 2147483647, %v589_v56 }
  0xe2   : > { %v593_v61 = vmul.f32 %v592_v58, %v590_v57 }
  0xe4   : > { %v594_v62 = vxor.u32 2147483648, %v593_v61 }
  0xe6   : > { %v595_v63 = vsel %vm474_vm13, %v594_v62, %v593_v61 }
  0xe7   : > { %v598_v2 = vsel %vm473_vm14, %v1417_v13, %v595_v63 }
  0xe8   : > { %v600_v3 = vmul.f32 %v598_v2, %v598_v2 }
  0xea   : > { %v601_v4 = vmul.f32 -0.001358992, %v600_v3  ;;  %v608_v5 = vmul.f32 -0.00019511016, %v600_v3 }
  0xec   : > { %v602_v7 = vadd.f32 0.041655596, %v601_v4  ;;  %v609_v8 = vadd.f32 0.008332121, %v608_v5 }
  0xee   : > { %v603_v10 = vmul.f32 %v602_v7, %v600_v3  ;;  %v610_v11 = vmul.f32 %v609_v8, %v600_v3 }
  0xf0   : > { %v604_v12 = vadd.f32 -0.4999988, %v603_v10  ;;  %v611_v14 = vadd.f32 -0.16666654, %v610_v11 }
  0xf2   : > { %v605_v16 = vmul.f32 %v604_v12, %v600_v3  ;;  %v612_v18 = vmul.f32 %v611_v14, %v600_v3 }
  0xf4   : > { %v606_v17 = vadd.f32 1.0, %v605_v16  ;;  %v613_v19 = vadd.f32 1.0, %v612_v18  ;;  %v1089_v16 = vld [vmem:[%s1544_s7 + $0x1] ss:$0 sm:$0xff] }
  0xf6   : > { %v614_v21 = vmul.f32 %v613_v19, %v598_v2  ;;  %v623_v23 = vxor.u32 2147483648, %v606_v17 }
  0xf8   : > { %v620_v26 = vxor.u32 2147483648, %v614_v21  ;;  %v624_v28 = vsel %vm622_vm1, %v623_v23, %v614_v21 }
  0xfa   : > { %v621_v27 = vsel %vm619_vm15, %v606_v17, %v620_v26 }
  0xfb   : > { %v625_v29 = vsel %vm618_vm2, %v621_v27, %v624_v28 }
  0xfc   : > { %v626_v31 = vsel %vm615_vm3, nan, %v625_v29 }
  0xfd   : > { %v627_v32 = vmul.f32 0.17677669, %v626_v31 }
  0xff   : > { %v661_v34 = vadd.f32 %v1087_v30, %v627_v32 }
 0x101   : > { %v1482_v22 = vadd.f32 %v661_v34, %v654_v33 }
 0x103   : > { %990 = vmatmul.msk.f32.vlgmr.msra.gmra.mxu1 %vm633_vm0, %v1482_v22 }
 0x180   : > { %v691_v13 = vpop.f32.mrf.mxu1 }
 0x181   : > { %v692_v35 = vadd.f32 %v1088_v25, %v691_v13 }
 0x183   : > { %v695_v0 = vmul.f32 0.70710677, %v692_v35  ;;  %v694_v11 = vmul.f32 0.5, %v692_v35 }
 0x185   : > { %v696_v36 = vmul.f32 %v695_v0, %v695_v0 }
 0x187   : > { %v697_v37 = vmin.f32 %v696_v36, 16.0 }
 0x189   : > { %v698_v38 = vmul.f32 2.1237322e-06, %v697_v37  ;;  %v709_v39 = vmul.f32 3.8918573e-05, %v697_v37 }
 0x18b   : > { %v699_v40 = vadd.f32 0.00028619796, %v698_v38  ;;  %v710_v41 = vadd.f32 0.001143296, %v709_v39 }
 0x18d   : > { %v700_v43 = vmul.f32 %v699_v40, %v697_v37  ;;  %v711_v42 = vmul.f32 %v710_v41, %v697_v37 }
 0x18f   : > { %v712_v44 = vadd.f32 0.014752088, %v711_v42  ;;  %v701_v45 = vadd.f32 0.0036580483, %v700_v43 }
 0x191   : > { %v713_v47 = vmul.f32 %v712_v44, %v697_v37  ;;  %v702_v49 = vmul.f32 %v701_v45, %v697_v37 }
 0x193   : > { %v714_v24 = vadd.f32 0.112945676, %v713_v47  ;;  %v703_v46 = vadd.f32 0.05243302, %v702_v49 }
 0x195   : > { %v715_v52 = vmul.f32 %v714_v24, %v697_v37  ;;  %v704_v57 = vmul.f32 %v703_v46, %v697_v37 }
 0x197   : > { %v716_v54 = vadd.f32 0.4994258, %v715_v52  ;;  %v705_v58 = vadd.f32 0.18741608, %v704_v57 }
 0x199   : > { %v717_v55 = vmul.f32 %v716_v54, %v697_v37  ;;  %v706_v60 = vmul.f32 %v705_v58, %v697_v37  ;;  %v817_v58 = vld [vmem:[%s1545_s8] sm:$0x1] }
 0x19b   : > { %v718_v56 = vadd.f32 1.0, %v717_v55  ;;  %v707_v1 = vadd.f32 1.1283791, %v706_v60 }
 0x19d   : > { %1090 = vrcp.f32 %v718_v56  ;;  %v730_v63 = vand.u32 2147483648, %v718_v56  ;;  %v728_v3 = vand.u32 2147483647, %v718_v56  ;;  %vm724_vm5 = vweird.f32 %v718_v56 }
 0x19e   : > { %v708_v6 = vmul.f32 %v707_v1, %v695_v0 }
 0x19f   : > { %v731_v5 = vor.u32 1.1754944e-38, %v730_v63  ;;  %vm729_vm7 = vcmp.eq.f32.partialorder %v728_v3, 8.507059e+37 }
 0x1a3   : > { %v1091_v59 = vpop.eup %1090 }
 0x1a4   : > { %v720_v61 = vmul.f32 %v1091_v59, %v718_v56  ;;  %vm725_vm4 = vweird.f32 %v1091_v59 }
 0x1a5   : > { %vm726_vm6 = vmor %vm724_vm5, %vm725_vm4 }
 0x1a6   : > { %v721_v62 = vsub.f32 1.0, %v720_v61 }
 0x1a8   : > { %v722_v2 = vmul.f32 %v1091_v59, %v721_v62 }
 0x1aa   : > { %v723_v4 = vadd.f32 %v1091_v59, %v722_v2 }
 0x1ac   : > { %v727_v7 = vsel %vm726_vm6, %v1091_v59, %v723_v4  ;;  %v819_v59 = vstv %s818_s9 }
 0x1ad   : > { %v732_v8 = vsel %vm729_vm7, %v731_v5, %v727_v7 }
 0x1ae   : > { %v733_v9 = vmul.f32 %v732_v8, %v708_v6 }
 0x1b0   : > { %v991_v10 = vclamps-f32 %v733_v9, 1.0 }
 0x1b2   : > { %v736_v12 = vadd.f32 1.0, %v991_v10 }
 0x1b4   : > { %v737_v14 = vmul.f32 %v736_v12, %v694_v11 }
 0x1b6   : > { %v738_v15 = vadd.f32 %v737_v14, %v1482_v22 }
 0x1b8   : > { %993 = vmatmul.msk.f32.vlgmr.msra.gmra.mxu2 %vm633_vm0, %v738_v15 }
 0x23b   : > { %v769_v18 = vpop.f32.mrf.mxu2 }
 0x23c   : > { %v770_v17 = vadd.f32 %v1089_v16, %v769_v18 }
 0x23e   : > { %v773_v19 = vmul.f32 0.70710677, %v770_v17  ;;  %v772_v46 = vmul.f32 0.5, %v770_v17 }
 0x240   : > { %v774_v20 = vmul.f32 %v773_v19, %v773_v19 }
 0x242   : > { %v775_v21 = vmin.f32 %v774_v20, 16.0 }
 0x244   : > { %v776_v23 = vmul.f32 2.1237322e-06, %v775_v21  ;;  %v787_v26 = vmul.f32 3.8918573e-05, %v775_v21 }
 0x246   : > { %v777_v27 = vadd.f32 0.00028619796, %v776_v23  ;;  %v788_v28 = vadd.f32 0.001143296, %v787_v26 }
 0x248   : > { %v778_v29 = vmul.f32 %v777_v27, %v775_v21  ;;  %v789_v30 = vmul.f32 %v788_v28, %v775_v21 }
 0x24a   : > { %v790_v31 = vadd.f32 0.014752088, %v789_v30  ;;  %v779_v32 = vadd.f32 0.0036580483, %v778_v29 }
 0x24c   : > { %v791_v33 = vmul.f32 %v790_v31, %v775_v21  ;;  %v780_v25 = vmul.f32 %v779_v32, %v775_v21 }
 0x24e   : > { %v792_v34 = vadd.f32 0.112945676, %v791_v33  ;;  %v781_v0 = vadd.f32 0.05243302, %v780_v25 }
 0x250   : > { %v793_v13 = vmul.f32 %v792_v34, %v775_v21  ;;  %v782_v38 = vmul.f32 %v781_v0, %v775_v21 }
 0x252   : > { %v794_v35 = vadd.f32 0.4994258, %v793_v13  ;;  %v783_v39 = vadd.f32 0.18741608, %v782_v38 }
 0x254   : > { %v795_v36 = vmul.f32 %v794_v35, %v775_v21  ;;  %v784_v41 = vmul.f32 %v783_v39, %v775_v21 }
 0x256   : > { %v796_v37 = vadd.f32 1.0, %v795_v36  ;;  %v785_v45 = vadd.f32 1.1283791, %v784_v41 }
 0x258   : > { %1092 = vrcp.f32 %v796_v37  ;;  %v808_v44 = vand.u32 2147483648, %v796_v37  ;;  %v806_v48 = vand.u32 2147483647, %v796_v37  ;;  %vm802_vm9 = vweird.f32 %v796_v37 }
 0x259   : > { %v786_v50 = vmul.f32 %v785_v45, %v773_v19 }
 0x25a   : > { %v809_v49 = vor.u32 1.1754944e-38, %v808_v44  ;;  %vm807_vm11 = vcmp.eq.f32.partialorder %v806_v48, 8.507059e+37 }
 0x25e   : > { %v1093_v40 = vpop.eup %1092 }
 0x25f   : > { %v798_v43 = vmul.f32 %v1093_v40, %v796_v37  ;;  %vm803_vm8 = vweird.f32 %v1093_v40 }
 0x260   : > { %vm804_vm10 = vmor %vm802_vm9, %vm803_vm8 }
 0x261   : > { %v799_v42 = vsub.f32 1.0, %v798_v43 }
 0x263   : > { %v800_v47 = vmul.f32 %v1093_v40, %v799_v42 }
 0x265   : > { %v801_v24 = vadd.f32 %v1093_v40, %v800_v47 }
 0x267   : > { %v805_v51 = vsel %vm804_vm10, %v1093_v40, %v801_v24 }
 0x268   : > { %v810_v52 = vsel %vm807_vm11, %v809_v49, %v805_v51 }
 0x269   : > { %v811_v53 = vmul.f32 %v810_v52, %v786_v50 }
 0x26b   : > { %v994_v54 = vclamps-f32 %v811_v53, 1.0 }
 0x26d   : > { %v814_v55 = vadd.f32 1.0, %v994_v54 }
 0x26f   : > { %v815_v56 = vmul.f32 %v814_v55, %v772_v46 }
 0x271   : > { %v816_v57 = vadd.f32 %v815_v56, %v1482_v22 }
 0x273   : > { %995 = vmatpush.xpose.msk.msra.mxu3 %vm633_vm0, %v816_v57 }
 0x276   : > { %996 = vmatmul.msk.f32.vlgmr.msra.gmra.mxu3 %vm633_vm0, %v817_v58 }
 0x2f9   : > { %v843_v22 = vpop.f32.mrf.mxu3 }
 0x2fa   : > { %v844_v60 = vadd.f32 %v843_v22, %v819_v59 }
 0x2fc   : > { %847 = vst.msk [vmem:[%s438_s22] sm:$0x1] %vm846_vm12, %v844_v60 }
 0x2fd   : > { %1181 = shalt.err (!%p1178_p9)
}
 0x2fe   : > { %1007 = dma.vmem_to_hbm [thread:$0]  (%p1351_p4), %s861_s12, 16, %s863_s29, %s849_s13  }
 0x2ff PF: > { %p1024_p10 = scmp.ge.s32.totalorder %s1240_s20, 2  ;;  %s874_s25 = sand.u32 1, %s1220_s15  }
 0x300   : > { %s875_s28 = scalar_lea.sflag [#allocation5], %s874_s25 }
 0x301   : > { %p1017_p11 = pnand %p1024_p10, %p1358_p8 }
 0x303   : > { %p1018_p12 = pneg %p1017_p11 }
 0x305   : > { %1215 = dma.done.wait (%p1018_p12), %s875_s28, 16  }
 0x306   : > { %1217 = vsyncadd (%p1018_p12), %s875_s28, 4294967280  ;;  %s26_s20 = sadd.s32 1, %s1240_s20   ;;  %s1556_s18 = sld [smem:[#allocation12_spill]] }
 0x307   : > { %p23_p13 = scmp.ge.s32.totalorder %s26_s20, 4   ;;  %s1557_s19 = sld [smem:[#allocation13_spill]] }
 0x308   : > { %s1558_s15 = smov %s1224_s16  ;;  %s1559_s16 = smov %s1228_s17 }
 0x309   : > { %s1560_s17 = smov %s1364_s27  ;;  %25 = sbr.rel (!%p23_p13) target bundleno = 8 (0x8), region = 112 }
 0x30e   :  { %880 = vsyncpa [#allocation4], 1 }
 0x30f   :  { %882 = vsyncpa [#allocation4 + $0x1], 1 }
 0x310   :  { %883 = vsyncpa [#allocation7], 1 }
 0x311   :  { %884 = vsyncpa [#allocation5], 1 }
 0x312   :  { %886 = vsyncpa [#allocation5 + $0x1], 1 }

// kernel: tpu_custom_call.1
= control target key start
LH: loop header
LB: loop body
LE: loop exit
PB: predicated region body
PF: predicated region fallthrough
CT: control target
= control target key end

     0   :  { %s1537_s0 = inlined_call_operand.vmem [shape: f32[2,8,1], index: 0, kind: input, shape index: {}]   ;;  %s1538_s1 = inlined_call_operand.vmem [shape: f32[1,32], index: 1, kind: input, shape index: {}]   ;;  %s1539_s2 = inlined_call_operand.vmem [shape: f32[1,32], index: 2, kind: input, shape index: {}]   ;;  %s1540_s3 = inlined_call_operand.vmem [shape: f32[2,1,32], index: 3, kind: input, shape index: {}]   ;;  %s1541_s4 = inlined_call_operand.vmem [shape: f32[2,8,32], index: 4, kind: input, shape index: {}]   ;;  %s1542_s5 = inlined_call_operand.hbm [shape: f32[32,32], index: 5, kind: input, shape index: {}]   ;;  %s1543_s6 = inlined_call_operand.hbm [shape: f32[2,32,32], index: 6, kind: input, shape index: {}]   ;;  %s1544_s7 = inlined_call_operand.vmem [shape: f32[2,1,32], index: 7, kind: input, shape index: {}]   ;;  %s1545_s8 = inlined_call_operand.vmem [shape: f32[1,32], index: 8, kind: input, shape index: {}]   ;;  %s1546_s9 = inlined_call_operand.<no memory space> [shape: f32[1], index: 9, kind: input, shape index: {}]   ;;  %s1547_s10 = inlined_call_operand.hbm [shape: f32[2,1,8], index: 10, kind: output, shape index: {}]  }
   0x1   :  { %15 = sst [smem:[#allocation2]] %s1546_s9 }
   0x2   :  { %16 = vsyncpa [#allocation4], 0 }
   0x3   :  { %17 = vsyncpa [#allocation7], 0 }
   0x4   :  { %18 = vsyncpa [#allocation5], 0 }
   0x5   :  { %20 = vsyncpa [#allocation5 + $0x1], 0  ;;  %s1311_s15 = smov 0   ;;  %s1313_s16 = smov 0  }
   0x6   :  { %s1315_s17 = smov 0   ;;  %s1317_s18 = smov 0  }
   0x7   :  { %s1319_s19 = smov 0   ;;  %s1321_s20 = smov 0  }
   0x8 LB: > { %1550 = sst [smem:[#allocation12_spill]] %s1236_s19  ;;  %s975_s9 = sadd.s32 4294967295, %s1240_s20   ;;  %s1240_s20 = sphi %s1321_s20, %s26_s20   ;;  %s1236_s19 = sphi %s1319_s19, %s1557_s19   ;;  %s1232_s18 = sphi %s1317_s18, %s1556_s18   ;;  %s1228_s17 = sphi %s1315_s17, %s1560_s17   ;;  %s1224_s16 = sphi %s1313_s16, %s1559_s16   ;;  %s1220_s15 = sphi %s1311_s15, %s1558_s15  }
   0x9   : > { %s976_s21 = sadd.s32 4294967294, %s1240_s20   ;;  %s38_s22 = sadd.s32 1, %s1236_s19 }
   0xa   : > { %s276_s23 = sadd.s32 1, %s1228_s17  ;;  %p40_p0 = scmp.ge.s32.totalorder %s38_s22, 2 }
   0xb   : > { %p286_p1 = scmp.ne.s32.totalorder %s1228_s17, %s1224_s16  ;;  %p287_p2 = scmp.eq.s32.totalorder %s975_s9, 1 }
   0xc   : > { %p292_p3 = scmp.ne.s32.totalorder %s1224_s16, %s1220_s15  ;;  %s1562_s22 = smov (%p40_p0, %s38_s22), 0 }
   0xd   : > { %1551 = sst [smem:[#allocation13_spill]] %s1562_s22  ;;  %p1351_p4 = por %p287_p2, %p286_p1 }
   0xe   : > { %p293_p5 = scmp.eq.s32.totalorder %s976_s21, 1  ;;  %s271_s25 = ssub.s32 %s1236_s19, %s1562_s22 }
   0xf   : > { %p977_p6 = scmp.ge.s32.totalorder %s1240_s20, 1  ;;  %p274_p7 = scmp.eq.s32.totalorder %s271_s25, 0 }
  0x10   : > { %p1358_p8 = por %p293_p5, %p292_p3  ;;  %p300_p9 = scmp.lt.s32.totalorder %s1240_s20, 3 }
  0x11   : > { %s1364_s27 = scalar_select %p274_p7, %s1228_s17, %s276_s23  }
  0x12   : > { %p1366_p10 = pnand %p977_p6, %p300_p9  ;;  %p1370_p11 = scmp.eq.s32.totalorder %s975_s9, 0 }
  0x13   : > { %s317_s12 = sshll.u32 %s1542_s5, 4  ;;  %s1242_s13 = smov [#allocation3]   ;;  %s318_s12 = int_to_ptr.hbm [resolvable:$true] %s317_s12 }
  0x14   : > { %p1009_p12 = pneg %p1366_p10  ;;  %s319_s14 = sshll.u32 %s1242_s13, 4  ;;  %s320_s14 = int_to_ptr.vmem [resolvable:$true] %s319_s14 }
  0x15   : > { %s331_s9 = sshll.u32 %s1543_s6, 4  ;;  %s1243_s25 = smov 128   ;;  %s332_s9 = int_to_ptr.hbm [resolvable:$true] %s331_s9 }
  0x16   : > { %p1010_p13 = pnand %p1370_p11, %p1009_p12  ;;  %s1244_s22 = smov 8  }
  0x17   : > { %s1245_s19 = smov [#allocation6]   ;;  %384 = sbr.rel (%p1366_p10) target bundleno = 767 (0x2ff), region = 60 }
  0x18   : > { %1012 = dma.hbm_to_vmem [thread:$0]  (!%p1010_p13), %s318_s12, 512, %s320_s14, [#allocation4], %s1243_s25, %s1243_s25, %s1244_s22  }
  0x19   : > { %s333_s30 = sshll.u32 %s1245_s19, 4  ;;  %s334_s30 = int_to_ptr.vmem [resolvable:$true] %s333_s30 }
  0x1a   : > { %1015 = dma.hbm_to_vmem [thread:$0]  (!%p1010_p13), %s332_s9, 1024, %s334_s30, [#allocation7], %s1243_s25, %s1243_s25, %s1244_s22  }
  0x1c   : > { %1207 = dma.done.wait (%p1370_p11), [#allocation4], 512  }
  0x1d   : > { %1209 = vsyncadd (%p1370_p11), [#allocation4], 4294966784 }
  0x1e   : > { %1211 = dma.done.wait (%p1370_p11), [#allocation7], 1024  }
  0x1f   : > { %1213 = vsyncadd (%p1370_p11), [#allocation7], 4294966272  ;;  %p439_p0 = scmp.lt.s32.totalorder %s1232_s18, 1  ;;  %v1246_v0 = vmov 0   ;;  %v632_v2 = vld [vmem:[#allocation3 + $0x18] sm:$0xff]  ;;  %v631_v3 = vld [vmem:[#allocation3 + $0x10] sm:$0xff]  ;;  %s858_s11 = scalar_lea.hbm %s1547_s10, %s1232_s18 }
  0x20   : > { %1084 = vset.pattern.permute.xlu0 %v1246_v0  ;;  %649 = vmatpush.msra.mxu0 %v632_v2  ;;  %v630_v4 = vld [vmem:[#allocation3 + $0x8] sm:$0xff]  ;;  %v629_v5 = vld [vmem:[#allocation3] sm:$0xff]  ;;  %vm633_vm0 = vcmask 261120   ;;  %v666_v11 = vld [vmem:[#allocation6 + $0x18] sm:$0xff]  ;;  %v1247_v25 = vmov 683565275  }
  0x21   : > { %s1397_s19 = scalar_select %p439_p0, %s1232_s18, 1  ;;  %v1085_v7 = vld [vmem:[%s1538_s1] ss:$0 sm:$0xff]  ;;  %v665_v12 = vld [vmem:[#allocation6 + $0x10] sm:$0xff]  ;;  %686 = vmatpush.msra.mxu1 %v666_v11  ;;  %v1248_v27 = vmov 2475754826  }
  0x22   : > { %650 = vmatpush.msra.mxu0 %v631_v3  ;;  %v1086_v8 = vld [vmem:[%s1539_s2] ss:$0 sm:$0xff]  ;;  %v1249_v30 = vmov 2131351028   ;;  %v1250_v33 = vmov 2102212464  }
  0x23   : > { %s984_s22 = sshll.u32 %s1397_s19, 3  ;;  %s448_s9 = scalar_lea.vmem %s1540_s3, %s1397_s19  ;;  %687 = vmatpush.msra.mxu1 %v665_v12  ;;  %v1251_v36 = vmov 920167782   ;;  %v1252_v39 = vmov 1326507024  }
  0x24   : > { %s445_s12 = scalar_lea.vmem %s1537_s0, %s984_s22  ;;  %s455_s14 = scalar_lea.vmem %s1541_s4, %s984_s22  ;;  %651 = vmatpush.msra.mxu0 %v630_v4 }
  0x25   : > { %v456_v1 = vld [vmem:[%s445_s12] sm:$0xff]  ;;  %s437_s25 = sand.u32 1, %s1224_s16   ;;  %s862_s29 = sshll.u32 %s858_s11, 4  ;;  %s863_s29 = int_to_ptr.hbm [resolvable:$true] %s862_s29 }
  0x26   : > { %460 = vperm.xlu0 %1084, %v456_v1   ;;  %v628_v6 = vld [vmem:[%s455_s14] sm:$0xff]  ;;  %652 = vmatpush.msra.mxu0 %v629_v5  ;;  %s438_s22 = scalar_lea.vmem [#allocation8], %s437_s25  ;;  %s849_s13 = scalar_lea.sflag [#allocation5], %s437_s25 }
  0x27   : > { %989 = vmatmul.msk.f32.vlgmr.msra.gmra.mxu0 %vm633_vm0, %v628_v6  ;;  %s860_s12 = sshll.u32 %s438_s22, 4  ;;  %s1168_s19 = sshra.s32 %s863_s29, 4  ;;  %s861_s12 = int_to_ptr.vmem [resolvable:$true] %s860_s12  ;;  %s1169_s19 = int_to_ptr.hbm [resolvable:$true] %s1168_s19 }
  0x28   : > { %s1170_s14 = scalar_lea.hbm %s1169_s19, 1  ;;  %s1174_s23 = scalar_lea.hbm %s1547_s10, 2 }
  0x29   : > { %p1171_p1 = scmp.ne.s32.totalorder %s1169_s19, %s1170_s14  ;;  %p1175_p5 = scmp.lt.s32.totalorder %s1169_s19, %s1547_s10 }
  0x2a   : > { %p1176_p6 = scmp.lt.s32.totalorder %s1174_s23, %s1170_s14 }
  0x2b   : > { %p1172_p2 = pnand %p1171_p1, %p1351_p4 }
  0x2c   : > { %p1177_p7 = por %p1176_p6, %p1175_p5 }
  0x2d   : > { %p1173_p3 = pneg %p1172_p2 }
  0x2f   : > { %p1178_p9 = pnand %p1177_p7, %p1173_p3 }
  0x98   : > { %v461_v9 = vpop.permute.xlu0 %460 }
  0x99   : > { %v466_v10 = vmul.f32 %v1085_v7, %v461_v9 }
  0x9b   : > { %v1417_v13 = vadd.f32 %v1086_v8, %v466_v10 }
  0x9d   : > { %v475_v14 = vand.u32 2139095040, %v1417_v13  ;;  %v472_v17 = vand.u32 2147483647, %v1417_v13  ;;  %vm474_vm13 = vcmp.lt.s32.totalorder %v1417_v13, 0 }
  0x9f   : > { %v476_v15 = vshrl.u32 %v475_v14, 23  ;;  %v479_v19 = vand.u32 8388607, %v472_v17  ;;  %vm473_vm14 = vcmp.le.f32.partialorder %v472_v17, 0.7853982 }
  0xa1   : > { %v986_v16 = vadd.s32 4294967169, %v476_v15  ;;  %v480_v23 = vor.u32 8388608, %v479_v19 }
  0xa3   : > { %v482_v18 = vadd.s32 1, %v986_v16  ;;  %v1434_v46 = vshll.u32 %v480_v23, 8 }
  0xa5   : > { %vm483_vm1 = vcmp.gt.s32.totalorder %v482_v18, 0  ;;  %v521_v55 = vand.u32 65535, %v1434_v46  ;;  %v522_v60 = vshrl.u32 %v1434_v46, 16 }
  0xa6   : > { %v484_v20 = vsel %vm483_vm1, %v482_v18, 0 }
  0xa7   : > { %v486_v21 = vand.u32 31, %v484_v20  ;;  %v1425_v24 = vshrl.u32 %v484_v20, 5 }
  0xa9   : > { %v1423_v22 = vsub.s32 32, %v486_v21  ;;  %v489_v26 = vshll.u32 %v1247_v25, %v486_v21  ;;  %v492_v28 = vshll.u32 %v1248_v27, %v486_v21  ;;  %v495_v32 = vshll.u32 %v1249_v30, %v486_v21 }
  0xaa   : > { %v498_v35 = vshll.u32 %v1250_v33, %v486_v21  ;;  %v501_v38 = vshll.u32 %v1251_v36, %v486_v21  ;;  %vm504_vm2 = vcmp.lt.s32.totalorder %v1425_v24, 1  ;;  %vm507_vm3 = vcmp.lt.s32.totalorder %v1425_v24, 4 }
  0xab   : > { %v490_v29 = vshrl.u32 %v1248_v27, %v1423_v22  ;;  %v493_v31 = vshrl.u32 %v1249_v30, %v1423_v22  ;;  %v496_v34 = vshrl.u32 %v1250_v33, %v1423_v22  ;;  %v499_v37 = vshrl.u32 %v1251_v36, %v1423_v22 }
  0xac   : > { %v502_v40 = vshrl.u32 %v1252_v39, %v1423_v22  ;;  %vm506_vm4 = vcmp.lt.s32.totalorder %v1425_v24, 3  ;;  %vm505_vm5 = vcmp.lt.s32.totalorder %v1425_v24, 2  ;;  %v488_v19 = vshrl.u32 %v1247_v25, %v1423_v22 }
  0xad   : > { %v491_v41 = vor.u32 %v490_v29, %v489_v26  ;;  %v494_v42 = vor.u32 %v493_v31, %v492_v28  ;;  %v497_v43 = vor.u32 %v496_v34, %v495_v32  ;;  %v500_v44 = vor.u32 %v499_v37, %v498_v35 }
  0xae   : > { %v503_v45 = vor.u32 %v502_v40, %v501_v38 }
  0xaf   : > { %v512_v47 = vsel %vm504_vm2, %v491_v41, %v494_v42  ;;  %v516_v48 = vsel %vm504_vm2, %v494_v42, %v497_v43  ;;  %v513_v49 = vsel %vm507_vm3, %v500_v44, 920167782  ;;  %v509_v12 = vsel %vm507_vm3, %v497_v43, 2102212464 }
  0xb0   : > { %v517_v50 = vsel %vm507_vm3, %v503_v45, 1326507024  ;;  %v514_v51 = vsel %vm506_vm4, %v497_v43, %v513_v49  ;;  %v508_v29 = vsel %vm504_vm2, %v488_v19, %v491_v41  ;;  %v510_v30 = vsel %vm506_vm4, %v494_v42, %v509_v12 }
  0xb1   : > { %v518_v52 = vsel %vm506_vm4, %v500_v44, %v517_v50  ;;  %v515_v53 = vsel %vm505_vm5, %v512_v47, %v514_v51  ;;  %v511_v22 = vsel %vm505_vm5, %v508_v29, %v510_v30  ;;  %vm615_vm3 = vweird.f32 %v1417_v13  ;;  %v1087_v30 = vld [vmem:[%s448_s9] ss:$0 sm:$0xff]  ;;  %s818_s9 = sld [smem:[#allocation2]] }
  0xb2   : > { %v519_v54 = vsel %vm505_vm5, %v516_v48, %v518_v52  ;;  %v545_v58 = vand.u32 65535, %v515_v53  ;;  %v546_v59 = vshrl.u32 %v515_v53, 16  ;;  %v565_v37 = vmul.u32 %v1434_v46, %v511_v22 }
  0xb3   : > { %v523_v56 = vand.u32 65535, %v519_v54  ;;  %v524_v57 = vshrl.u32 %v519_v54, 16 }
  0xb4   : > { %v548_v62 = vmul.u32 %v546_v59, %v521_v55  ;;  %v549_v1 = vmul.u32 %v545_v58, %v522_v60  ;;  %v547_v4 = vmul.u32 %v545_v58, %v521_v55  ;;  %v550_v7 = vmul.u32 %v546_v59, %v522_v60  ;;  %v664_v59 = vld [vmem:[#allocation6 + $0x8] sm:$0xff] }
  0xb5   : > { %v526_v61 = vmul.u32 %v524_v57, %v521_v55  ;;  %v527_v63 = vmul.u32 %v523_v56, %v522_v60  ;;  %v525_v2 = vmul.u32 %v523_v56, %v521_v55  ;;  %v528_v6 = vmul.u32 %v524_v57, %v522_v60  ;;  %v663_v60 = vld [vmem:[#allocation6] sm:$0xff]  ;;  %688 = vmatpush.msra.mxu1 %v664_v59 }
  0xb6   : > { %v551_v5 = vshll.u32 %v548_v62, 16  ;;  %v553_v9 = vshll.u32 %v549_v1, 16  ;;  %v552_v27 = vshrl.u32 %v548_v62, 16  ;;  %v554_v33 = vshrl.u32 %v549_v1, 16 }
  0xb7   : > { %v529_v3 = vshll.u32 %v526_v61, 16  ;;  %v531_v8 = vshll.u32 %v527_v63, 16  ;;  %v530_v23 = vshrl.u32 %v526_v61, 16  ;;  %v532_v31 = vshrl.u32 %v527_v63, 16  ;;  %689 = vmatpush.msra.mxu1 %v663_v60 }
  0xb8   : > { %vm555_vm7 = vc.u32 %v547_v4, %v551_v5  ;;  %v557_v11 = vadd.s32 %v551_v5, %v547_v4 }
  0xb9   : > { %vm533_vm6 = vc.u32 %v525_v2, %v529_v3  ;;  %v535_v10 = vadd.s32 %v529_v3, %v525_v2  ;;  %v556_v15 = vsel %vm555_vm7, 1, %v1246_v0 }
  0xba   : > { %v534_v14 = vsel %vm533_vm6, 1, %v1246_v0  ;;  %v558_v18 = vadd.s32 %v556_v15, %v550_v7  ;;  %vm559_vm9 = vc.u32 %v557_v11, %v553_v9  ;;  %v561_v35 = vadd.s32 %v557_v11, %v553_v9 }
  0xbb   : > { %v536_v16 = vadd.s32 %v534_v14, %v528_v6  ;;  %vm537_vm8 = vc.u32 %v535_v10, %v531_v8  ;;  %v560_v21 = vsel %vm559_vm9, 1, %v1246_v0 }
  0xbc   : > { %v538_v20 = vsel %vm537_vm8, 1, %v1246_v0  ;;  %v562_v28 = vadd.s32 %v560_v21, %v558_v18 }
  0xbd   : > { %v540_v26 = vadd.s32 %v538_v20, %v536_v16 }
  0xbe   : > { %v563_v34 = vadd.s32 %v562_v28, %v552_v27 }
  0xbf   : > { %v541_v32 = vadd.s32 %v540_v26, %v530_v23 }
  0xc0   : > { %v564_v0 = vadd.s32 %v563_v34, %v554_v33  ;;  %v654_v33 = vpop.f32.mrf.mxu0 }
  0xc1   : > { %v542_v25 = vadd.s32 %v541_v32, %v532_v31 }
  0xc2   : > { %v568_v36 = vadd.s32 1, %v564_v0 }
  0xc3   : > { %vm567_vm10 = vc.u32 %v542_v25, %v561_v35  ;;  %v566_v49 = vadd.s32 %v561_v35, %v542_v25  ;;  %v1088_v25 = vld [vmem:[%s1544_s7] ss:$0 sm:$0xff] }
  0xc4   : > { %v569_v38 = vsel %vm567_vm10, %v568_v36, %v564_v0 }
  0xc5   : > { %v570_v39 = vadd.s32 %v569_v38, %v565_v37 }
  0xc7   : > { %v571_v40 = vadd.s32 536870912, %v570_v39 }
  0xc9   : > { %v572_v41 = vshrl.u32 %v571_v40, 30 }
  0xcb   : > { %v573_v43 = vshll.u32 %v572_v41, 30  ;;  %v596_v1 = vsub.s32 4, %v572_v41 }
  0xcd   : > { %v574_v42 = vsub.s32 %v570_v39, %v573_v43  ;;  %v597_v6 = vsel %vm474_vm13, %v596_v1, %v572_v41 }
  0xce   : > { %v599_v9 = vsel %vm473_vm14, 0, %v597_v6 }
  0xcf   : > { %vm575_vm11 = vcmp.lt.s32.totalorder %v574_v42, 0  ;;  %v576_v44 = vsub.s32 0, %v574_v42  ;;  %v616_v15 = vadd.s32 3, %v599_v9 }
  0xd1   : > { %v577_v45 = vsel %vm575_vm11, %v576_v44, %v574_v42  ;;  %v617_v20 = vand.u32 3, %v616_v15 }
  0xd2   : > { %v578_v47 = vclz %v577_v45 }
  0xd3   : > { %vm619_vm15 = vcmp.eq.s32.totalorder %v617_v20, 0  ;;  %vm622_vm1 = vcmp.eq.s32.totalorder %v617_v20, 2  ;;  %vm618_vm2 = vcmp.lt.s32.totalorder %v617_v20, 2 }
  0xd4   : > { %v987_v48 = vadd.s32 4294967294, %v578_v47 }
  0xd6   : > { %vm988_vm12 = vcmp.lt.s32.totalorder %v987_v48, 0 }
  0xd7   : > { %v581_v24 = vsel %vm988_vm12, 0, %v987_v48  ;;  %v743_v48 = vld [vmem:[#allocation6 + $0x38] sm:$0xff]  ;;  %vm846_vm12 = vcmask 57344  }
  0xd8   : > { %v582_v50 = vsub.s32 32, %v581_v24  ;;  %v586_v51 = vsub.s32 4294967266, %v581_v24  ;;  %v583_v52 = vshll.u32 %v574_v42, %v581_v24  ;;  %764 = vmatpush.msra.mxu2 %v743_v48 }
  0xda   : > { %v584_v53 = vshrl.u32 %v566_v49, %v582_v50  ;;  %v587_v54 = vadd.s32 127, %v586_v51  ;;  %v742_v50 = vld [vmem:[#allocation6 + $0x30] sm:$0xff]  ;;  %v741_v51 = vld [vmem:[#allocation6 + $0x28] sm:$0xff] }
  0xdb   : > { %765 = vmatpush.msra.mxu2 %v742_v50 }
  0xdc   : > { %v585_v46 = vor.u32 %v584_v53, %v583_v52  ;;  %v588_v55 = vshll.u32 %v587_v54, 23  ;;  %v740_v53 = vld [vmem:[#allocation6 + $0x20] sm:$0xff] }
  0xdd   : > { %766 = vmatpush.msra.mxu2 %v741_v51 }
  0xde   : > { %v589_v56 = vor.u32 4788187, %v588_v55  ;;  %v592_v58 = vcvt.s32.f32 %v585_v46 }
  0xdf   : > { %767 = vmatpush.msra.mxu2 %v740_v53 }
  0xe0   : > { %v590_v57 = vand.u32 2147483647, %v589_v56 }
  0xe2   : > { %v593_v61 = vmul.f32 %v592_v58, %v590_v57 }
  0xe4   : > { %v594_v62 = vxor.u32 2147483648, %v593_v61 }
  0xe6   : > { %v595_v63 = vsel %vm474_vm13, %v594_v62, %v593_v61 }
  0xe7   : > { %v598_v2 = vsel %vm473_vm14, %v1417_v13, %v595_v63 }
  0xe8   : > { %v600_v3 = vmul.f32 %v598_v2, %v598_v2 }
  0xea   : > { %v601_v4 = vmul.f32 -0.001358992, %v600_v3  ;;  %v608_v5 = vmul.f32 -0.00019511016, %v600_v3 }
  0xec   : > { %v602_v7 = vadd.f32 0.041655596, %v601_v4  ;;  %v609_v8 = vadd.f32 0.008332121, %v608_v5 }
  0xee   : > { %v603_v10 = vmul.f32 %v602_v7, %v600_v3  ;;  %v610_v11 = vmul.f32 %v609_v8, %v600_v3 }
  0xf0   : > { %v604_v12 = vadd.f32 -0.4999988, %v603_v10  ;;  %v611_v14 = vadd.f32 -0.16666654, %v610_v11 }
  0xf2   : > { %v605_v16 = vmul.f32 %v604_v12, %v600_v3  ;;  %v612_v18 = vmul.f32 %v611_v14, %v600_v3 }
  0xf4   : > { %v606_v17 = vadd.f32 1.0, %v605_v16  ;;  %v613_v19 = vadd.f32 1.0, %v612_v18  ;;  %v1089_v16 = vld [vmem:[%s1544_s7 + $0x1] ss:$0 sm:$0xff] }
  0xf6   : > { %v614_v21 = vmul.f32 %v613_v19, %v598_v2  ;;  %v623_v23 = vxor.u32 2147483648, %v606_v17 }
  0xf8   : > { %v620_v26 = vxor.u32 2147483648, %v614_v21  ;;  %v624_v28 = vsel %vm622_vm1, %v623_v23, %v614_v21 }
  0xfa   : > { %v621_v27 = vsel %vm619_vm15, %v606_v17, %v620_v26 }
  0xfb   : > { %v625_v29 = vsel %vm618_vm2, %v621_v27, %v624_v28 }
  0xfc   : > { %v626_v31 = vsel %vm615_vm3, nan, %v625_v29 }
  0xfd   : > { %v627_v32 = vmul.f32 0.17677669, %v626_v31 }
  0xff   : > { %v661_v34 = vadd.f32 %v1087_v30, %v627_v32 }
 0x101   : > { %v1482_v22 = vadd.f32 %v661_v34, %v654_v33 }
 0x103   : > { %990 = vmatmul.msk.f32.vlgmr.msra.gmra.mxu1 %vm633_vm0, %v1482_v22 }
 0x180   : > { %v691_v13 = vpop.f32.mrf.mxu1 }
 0x181   : > { %v692_v35 = vadd.f32 %v1088_v25, %v691_v13 }
 0x183   : > { %v695_v0 = vmul.f32 0.70710677, %v692_v35  ;;  %v694_v11 = vmul.f32 0.5, %v692_v35 }
 0x185   : > { %v696_v36 = vmul.f32 %v695_v0, %v695_v0 }
 0x187   : > { %v697_v37 = vmin.f32 %v696_v36, 16.0 }
 0x189   : > { %v698_v38 = vmul.f32 2.1237322e-06, %v697_v37  ;;  %v709_v39 = vmul.f32 3.8918573e-05, %v697_v37 }
 0x18b   : > { %v699_v40 = vadd.f32 0.00028619796, %v698_v38  ;;  %v710_v41 = vadd.f32 0.001143296, %v709_v39 }
 0x18d   : > { %v700_v43 = vmul.f32 %v699_v40, %v697_v37  ;;  %v711_v42 = vmul.f32 %v710_v41, %v697_v37 }
 0x18f   : > { %v712_v44 = vadd.f32 0.014752088, %v711_v42  ;;  %v701_v45 = vadd.f32 0.0036580483, %v700_v43 }
 0x191   : > { %v713_v47 = vmul.f32 %v712_v44, %v697_v37  ;;  %v702_v49 = vmul.f32 %v701_v45, %v697_v37 }
 0x193   : > { %v714_v24 = vadd.f32 0.112945676, %v713_v47  ;;  %v703_v46 = vadd.f32 0.05243302, %v702_v49 }
 0x195   : > { %v715_v52 = vmul.f32 %v714_v24, %v697_v37  ;;  %v704_v57 = vmul.f32 %v703_v46, %v697_v37 }
 0x197   : > { %v716_v54 = vadd.f32 0.4994258, %v715_v52  ;;  %v705_v58 = vadd.f32 0.18741608, %v704_v57 }
 0x199   : > { %v717_v55 = vmul.f32 %v716_v54, %v697_v37  ;;  %v706_v60 = vmul.f32 %v705_v58, %v697_v37  ;;  %v817_v58 = vld [vmem:[%s1545_s8] sm:$0x1] }
 0x19b   : > { %v718_v56 = vadd.f32 1.0, %v717_v55  ;;  %v707_v1 = vadd.f32 1.1283791, %v706_v60 }
 0x19d   : > { %1090 = vrcp.f32 %v718_v56  ;;  %v730_v63 = vand.u32 2147483648, %v718_v56  ;;  %v728_v3 = vand.u32 2147483647, %v718_v56  ;;  %vm724_vm5 = vweird.f32 %v718_v56 }
 0x19e   : > { %v708_v6 = vmul.f32 %v707_v1, %v695_v0 }
 0x19f   : > { %v731_v5 = vor.u32 1.1754944e-38, %v730_v63  ;;  %vm729_vm7 = vcmp.eq.f32.partialorder %v728_v3, 8.507059e+37 }
 0x1a3   : > { %v1091_v59 = vpop.eup %1090 }
 0x1a4   : > { %v720_v61 = vmul.f32 %v1091_v59, %v718_v56  ;;  %vm725_vm4 = vweird.f32 %v1091_v59 }
 0x1a5   : > { %vm726_vm6 = vmor %vm724_vm5, %vm725_vm4 }
 0x1a6   : > { %v721_v62 = vsub.f32 1.0, %v720_v61 }
 0x1a8   : > { %v722_v2 = vmul.f32 %v1091_v59, %v721_v62 }
 0x1aa   : > { %v723_v4 = vadd.f32 %v1091_v59, %v722_v2 }
 0x1ac   : > { %v727_v7 = vsel %vm726_vm6, %v1091_v59, %v723_v4  ;;  %v819_v59 = vstv %s818_s9 }
 0x1ad   : > { %v732_v8 = vsel %vm729_vm7, %v731_v5, %v727_v7 }
 0x1ae   : > { %v733_v9 = vmul.f32 %v732_v8, %v708_v6 }
 0x1b0   : > { %v991_v10 = vclamps-f32 %v733_v9, 1.0 }
 0x1b2   : > { %v736_v12 = vadd.f32 1.0, %v991_v10 }
 0x1b4   : > { %v737_v14 = vmul.f32 %v736_v12, %v694_v11 }
 0x1b6   : > { %v738_v15 = vadd.f32 %v737_v14, %v1482_v22 }
 0x1b8   : > { %993 = vmatmul.msk.f32.vlgmr.msra.gmra.mxu2 %vm633_vm0, %v738_v15 }
 0x23b   : > { %v769_v18 = vpop.f32.mrf.mxu2 }
 0x23c   : > { %v770_v17 = vadd.f32 %v1089_v16, %v769_v18 }
 0x23e   : > { %v773_v19 = vmul.f32 0.70710677, %v770_v17  ;;  %v772_v46 = vmul.f32 0.5, %v770_v17 }
 0x240   : > { %v774_v20 = vmul.f32 %v773_v19, %v773_v19 }
 0x242   : > { %v775_v21 = vmin.f32 %v774_v20, 16.0 }
 0x244   : > { %v776_v23 = vmul.f32 2.1237322e-06, %v775_v21  ;;  %v787_v26 = vmul.f32 3.8918573e-05, %v775_v21 }
 0x246   : > { %v777_v27 = vadd.f32 0.00028619796, %v776_v23  ;;  %v788_v28 = vadd.f32 0.001143296, %v787_v26 }
 0x248   : > { %v778_v29 = vmul.f32 %v777_v27, %v775_v21  ;;  %v789_v30 = vmul.f32 %v788_v28, %v775_v21 }
 0x24a   : > { %v790_v31 = vadd.f32 0.014752088, %v789_v30  ;;  %v779_v32 = vadd.f32 0.0036580483, %v778_v29 }
 0x24c   : > { %v791_v33 = vmul.f32 %v790_v31, %v775_v21  ;;  %v780_v25 = vmul.f32 %v779_v32, %v775_v21 }
 0x24e   : > { %v792_v34 = vadd.f32 0.112945676, %v791_v33  ;;  %v781_v0 = vadd.f32 0.05243302, %v780_v25 }
 0x250   : > { %v793_v13 = vmul.f32 %v792_v34, %v775_v21  ;;  %v782_v38 = vmul.f32 %v781_v0, %v775_v21 }
 0x252   : > { %v794_v35 = vadd.f32 0.4994258, %v793_v13  ;;  %v783_v39 = vadd.f32 0.18741608, %v782_v38 }
 0x254   : > { %v795_v36 = vmul.f32 %v794_v35, %v775_v21  ;;  %v784_v41 = vmul.f32 %v783_v39, %v775_v21 }
 0x256   : > { %v796_v37 = vadd.f32 1.0, %v795_v36  ;;  %v785_v45 = vadd.f32 1.1283791, %v784_v41 }
 0x258   : > { %1092 = vrcp.f32 %v796_v37  ;;  %v808_v44 = vand.u32 2147483648, %v796_v37  ;;  %v806_v48 = vand.u32 2147483647, %v796_v37  ;;  %vm802_vm9 = vweird.f32 %v796_v37 }
 0x259   : > { %v786_v50 = vmul.f32 %v785_v45, %v773_v19 }
 0x25a   : > { %v809_v49 = vor.u32 1.1754944e-38, %v808_v44  ;;  %vm807_vm11 = vcmp.eq.f32.partialorder %v806_v48, 8.507059e+37 }
 0x25e   : > { %v1093_v40 = vpop.eup %1092 }
 0x25f   : > { %v798_v43 = vmul.f32 %v1093_v40, %v796_v37  ;;  %vm803_vm8 = vweird.f32 %v1093_v40 }
 0x260   : > { %vm804_vm10 = vmor %vm802_vm9, %vm803_vm8 }
 0x261   : > { %v799_v42 = vsub.f32 1.0, %v798_v43 }
 0x263   : > { %v800_v47 = vmul.f32 %v1093_v40, %v799_v42 }
 0x265   : > { %v801_v24 = vadd.f32 %v1093_v40, %v800_v47 }
 0x267   : > { %v805_v51 = vsel %vm804_vm10, %v1093_v40, %v801_v24 }
 0x268   : > { %v810_v52 = vsel %vm807_vm11, %v809_v49, %v805_v51 }
 0x269   : > { %v811_v53 = vmul.f32 %v810_v52, %v786_v50 }
 0x26b   : > { %v994_v54 = vclamps-f32 %v811_v53, 1.0 }
 0x26d   : > { %v814_v55 = vadd.f32 1.0, %v994_v54 }
 0x26f   : > { %v815_v56 = vmul.f32 %v814_v55, %v772_v46 }
 0x271   : > { %v816_v57 = vadd.f32 %v815_v56, %v1482_v22 }
 0x273   : > { %995 = vmatpush.xpose.msk.msra.mxu3 %vm633_vm0, %v816_v57 }
 0x276   : > { %996 = vmatmul.msk.f32.vlgmr.msra.gmra.mxu3 %vm633_vm0, %v817_v58 }
 0x2f9   : > { %v843_v22 = vpop.f32.mrf.mxu3 }
 0x2fa   : > { %v844_v60 = vadd.f32 %v843_v22, %v819_v59 }
 0x2fc   : > { %847 = vst.msk [vmem:[%s438_s22] sm:$0x1] %vm846_vm12, %v844_v60 }
 0x2fd   : > { %1181 = shalt.err (!%p1178_p9)
}
 0x2fe   : > { %1007 = dma.vmem_to_hbm [thread:$0]  (%p1351_p4), %s861_s12, 16, %s863_s29, %s849_s13  }
 0x2ff PF: > { %p1024_p10 = scmp.ge.s32.totalorder %s1240_s20, 2  ;;  %s874_s25 = sand.u32 1, %s1220_s15  }
 0x300   : > { %s875_s28 = scalar_lea.sflag [#allocation5], %s874_s25 }
 0x301   : > { %p1017_p11 = pnand %p1024_p10, %p1358_p8 }
 0x303   : > { %p1018_p12 = pneg %p1017_p11 }
 0x305   : > { %1215 = dma.done.wait (%p1018_p12), %s875_s28, 16  }
 0x306   : > { %1217 = vsyncadd (%p1018_p12), %s875_s28, 4294967280  ;;  %s26_s20 = sadd.s32 1, %s1240_s20   ;;  %s1556_s18 = sld [smem:[#allocation12_spill]] }
 0x307   : > { %p23_p13 = scmp.ge.s32.totalorder %s26_s20, 4   ;;  %s1557_s19 = sld [smem:[#allocation13_spill]] }
 0x308   : > { %s1558_s15 = smov %s1224_s16  ;;  %s1559_s16 = smov %s1228_s17 }
 0x309   : > { %s1560_s17 = smov %s1364_s27  ;;  %25 = sbr.rel (!%p23_p13) target bundleno = 8 (0x8), region = 112 }
 0x30e   :  { %880 = vsyncpa [#allocation4], 1 }
 0x30f   :  { %882 = vsyncpa [#allocation4 + $0x1], 1 }
 0x310   :  { %883 = vsyncpa [#allocation7], 1 }
 0x311   :  { %884 = vsyncpa [#allocation5], 1 }
 0x312   :  { %886 = vsyncpa [#allocation5 + $0x1], 1 }

</bundles_post_ra>
